<compile_context>
chip_gen: v7x
topology: tpu7x:2x2x1
jax: 0.10.0
libtpu: 0.0.40
codegen_flags: <defaults>
</compile_context>

<pallas_src>
import functools
import math

import numpy as np
import jax
import jax.numpy as jnp
from jax import lax
from jax.experimental import pallas as pl
from jax.experimental.pallas import tpu as pltpu


# ---------------------------------------------------------------------------
# Fused kernel: QKV projection + raw-reshape head split + attention + head merge + fc
# ---------------------------------------------------------------------------
def _fused_mha_kernel(q_ref, k_ref, v_ref, wq_ref, wk_ref, wv_ref, fc_ref, perm_ref,
                      o_ref, proj_s, split_s, ctx_s, *,
                      scale, n_heads, rows_per_head, seq_per_head, d_k, d_v):
    H, Lr, L2 = n_heads, rows_per_head, seq_per_head

    # --- 1. Q/K/V projections.  Weights are pre-transposed in the wrapper, so x @ W^T
    #        is a plain x @ Wt (no in-kernel operand transpose).
    proj_s[0] = jnp.dot(q_ref[0], wq_ref[...], preferred_element_type=jnp.float32)
    proj_s[1] = jnp.dot(k_ref[0], wk_ref[...], preferred_element_type=jnp.float32)
    proj_s[2] = jnp.dot(v_ref[0], wv_ref[...], preferred_element_type=jnp.float32)

    # --- 2. Raw row-major head split: reshape([L, H*d_k]) -> [H, L2, d_k], done as H*H
    #        static block copies per tensor.  Within each head the rows are stored in
    #        column-block-major ("permuted") order p = j*Lr + a instead of the true order
    #        t = a*H + j; the permutation is undone at the end with one exact 0/1 matmul.
    for t in range(3):
        for h in range(H):
            for j in range(H):
                split_s[t, h * L2 + j * Lr:h * L2 + (j + 1) * Lr, :] = \
                    proj_s[t, h * Lr:(h + 1) * Lr, j * d_k:(j + 1) * d_k]

    # --- 3. Per-head softmax attention.  Contexts are written straight into the
    #        head-merged [L2, H*d_v] slab: this IS context.transpose(1,2).view(B,-1,H*d_v).
    for h in range(H):
        q = split_s[0, h * L2:(h + 1) * L2, :] * scale       # scale q, not the LxL scores
        k = split_s[1, h * L2:(h + 1) * L2, :]
        v = split_s[2, h * L2:(h + 1) * L2, :]
        s = lax.dot_general(q, k, (((1,), (1,)), ((), ())),   # q @ k^T  -> [L2, L2]
                            preferred_element_type=jnp.float32)
        s = s - jnp.max(s, axis=-1, keepdims=True)
        p = jnp.exp(s)
        p = p * pl.reciprocal(jnp.sum(p, axis=-1, keepdims=True), approx=True)
        ctx_s[:, h * d_v:(h + 1) * d_v] = jnp.dot(p, v, preferred_element_type=jnp.float32)

    # --- 4. Undo the per-head row permutation (exact 0/1 matmul), then ONE fc matmul
    #        on the merged context slab, then a single lane-dense tile store.
    ctx = jnp.dot(perm_ref[...], ctx_s[...], preferred_element_type=jnp.float32)
    o_ref[...] = jnp.dot(ctx, fc_ref[...], preferred_element_type=jnp.float32)


def mha_forward(Q, K, V, params, *, n_heads, d_k, d_model):
    B, L, D = Q.shape
    H = n_heads
    d_v = d_k
    assert D == d_model
    # The module constructs d_k = d_model // n_heads; the fused row/column bookkeeping
    # below relies on these two divisibility facts (reviewer correctness concern).
    assert d_model == n_heads * d_k, "kernel assumes d_model == n_heads * d_k"
    assert L % n_heads == 0, "raw-reshape head split requires seq_len % n_heads == 0"

    L2 = L          # per-head sequence length produced by reshape(batch, n_heads, -1, d_k)
    Lr = L // H     # projected input rows feeding each head

    # One-time, weight-only transposes (amortized; keeps every in-kernel dot plain x @ W).
    WQt = params["WQ"].T            # [d_model, H*d_k]
    WKt = params["WK"].T
    WVt = params["WV"].T
    fct = params["fc"].T            # [H*d_v, d_model]

    # Exact 0/1 matrix mapping the kernel's column-block-major per-head row order
    # (p = j*Lr + a) back to the true raw-reshape order (t = a*H + j).
    perm_idx = np.array([(t % H) * Lr + t // H for t in range(L2)], dtype=np.int64)
    perm = jnp.asarray(np.eye(L2, dtype=np.float32)[perm_idx])

    scale = 1.0 / math.sqrt(d_k)
    kernel = functools.partial(
        _fused_mha_kernel, scale=scale, n_heads=H, rows_per_head=Lr,
        seq_per_head=L2, d_k=d_k, d_v=d_v)

    flops_per_batch = (3 * 2 * L * D * D
                       + H * (2 * L2 * L2 * d_k + 2 * L2 * L2 * d_v)
                       + 2 * L2 * L2 * (H * d_v)
                       + 2 * L2 * (H * d_v) * D)
    bytes_accessed = 4 * (3 * B * L * D + 3 * D * D + H * d_v * D + L2 * L2 + B * L2 * D)
    # Explicit VMEM budget: double-buffered in/out blocks + scratch, with generous margin.
    block_bytes = 4 * (2 * (3 * L * D + 3 * D * D + H * d_v * D + L2 * L2 + L2 * D)
                       + (3 * L * D + 3 * H * L2 * d_k + L2 * H * d_v))
    vmem_limit = int(min(96 * 2 ** 20, max(4 * 2 ** 20, 4 * block_bytes)))

    out2d = pl.pallas_call(
        kernel,
        out_shape=jax.ShapeDtypeStruct((B * L2, d_model), jnp.float32),
        grid=(B,),
        in_specs=[
            pl.BlockSpec((1, L, D), lambda b: (b, 0, 0)),           # Q
            pl.BlockSpec((1, L, D), lambda b: (b, 0, 0)),           # K
            pl.BlockSpec((1, L, D), lambda b: (b, 0, 0)),           # V
            pl.BlockSpec((D, H * d_k), lambda b: (0, 0)),           # WQ^T (constant block)
            pl.BlockSpec((D, H * d_k), lambda b: (0, 0)),           # WK^T
            pl.BlockSpec((D, H * d_v), lambda b: (0, 0)),           # WV^T
            pl.BlockSpec((H * d_v, d_model), lambda b: (0, 0)),     # fc^T
            pl.BlockSpec((L2, L2), lambda b: (0, 0)),               # row un-permutation
        ],
        out_specs=pl.BlockSpec((L2, d_model), lambda b: (b, 0)),
        scratch_shapes=[
            pltpu.VMEM((3, L, H * d_k), jnp.float32),    # projected q/k/v
            pltpu.VMEM((3, H * L2, d_k), jnp.float32),   # head-split q/k/v (perm row order)
            pltpu.VMEM((L2, H * d_v), jnp.float32),      # merged per-head contexts
        ],
        compiler_params=pltpu.CompilerParams(
            dimension_semantics=("parallel",),           # batch axis -> both TCs on v7x
            vmem_limit_bytes=vmem_limit),
        cost_estimate=pl.CostEstimate(
            flops=B * flops_per_batch,
            transcendentals=B * H * L2 * L2,
            bytes_accessed=bytes_accessed),
    )(Q, K, V, WQt, WKt, WVt, fct, perm)

    return out2d.reshape(B, L2, d_model)


# ---------------------------------------------------------------------------
# Pure-JAX reference (mirrors the PyTorch module exactly, incl. the raw reshape split)
# ---------------------------------------------------------------------------
def mha_reference(Q, K, V, params, *, n_heads, d_k, d_model):
    B, L, D = Q.shape
    d_v = d_k
    q_s = (Q @ params["WQ"].T).reshape(B, n_heads, -1, d_k)
    k_s = (K @ params["WK"].T).reshape(B, n_heads, -1, d_k)
    v_s = (V @ params["WV"].T).reshape(B, n_heads, -1, d_v)
    s = jnp.einsum("bhqd,bhkd->bhqk", q_s, k_s) / math.sqrt(d_k)
    a = jax.nn.softmax(s, axis=-1)
    ctx = jnp.einsum("bhqk,bhkd->bhqd", a, v_s)
    ctx = jnp.transpose(ctx, (0, 2, 1, 3)).reshape(B, -1, n_heads * d_v)
    return (ctx @ params["fc"].T).reshape(B, -1, d_model)


# ---------------------------------------------------------------------------
# Main
# ---------------------------------------------------------------------------
if __name__ == "__main__":
    B, L, d_model, n_heads = 2, 8, 32, 4
    d_k = d_model // n_heads
    d_v = d_k

    key = jax.random.PRNGKey(0)
    kwq, kwk, kwv, kfc, kq, kk, kv = jax.random.split(key, 7)

    # Deterministic parameter init (nn.Linear default scale, bias=False everywhere).
    b1 = 1.0 / math.sqrt(d_model)
    b2 = 1.0 / math.sqrt(n_heads * d_v)
    params = {
        "WQ": jax.random.uniform(kwq, (d_k * n_heads, d_model),
                                 minval=-b1, maxval=b1, dtype=jnp.float32),
        "WK": jax.random.uniform(kwk, (d_k * n_heads, d_model),
                                 minval=-b1, maxval=b1, dtype=jnp.float32),
        "WV": jax.random.uniform(kwv, (d_v * n_heads, d_model),
                                 minval=-b1, maxval=b1, dtype=jnp.float32),
        "fc": jax.random.uniform(kfc, (d_model, n_heads * d_v),
                                 minval=-b2, maxval=b2, dtype=jnp.float32),
    }

    Q = jax.random.normal(kq, (B, L, d_model), dtype=jnp.float32)
    K = jax.random.normal(kk, (B, L, d_model), dtype=jnp.float32)
    V = jax.random.normal(kv, (B, L, d_model), dtype=jnp.float32)

    out = mha_forward(Q, K, V, params, n_heads=n_heads, d_k=d_k, d_model=d_model)
    out = jax.block_until_ready(out)

    ref = mha_reference(Q, K, V, params, n_heads=n_heads, d_k=d_k, d_model=d_model)
    assert out.shape == (B, L, d_model)
    # tolerance accounts for the approx-reciprocal softmax denominator (EUP vrcp)
    assert jnp.allclose(out, ref, atol=1e-3, rtol=1e-3), \
        f"max abs err {jnp.max(jnp.abs(out - ref))}"

    print("KERNEL_OK")
</pallas_src>

<mosaic_0001>
module attributes {stable_mosaic.version = 11 : i64} {
  func.func @_fused_mha_kernel(%arg0: i32, %arg1: memref<1x8x32xf32, #tpu.memory_space<vmem>>, %arg2: memref<1x8x32xf32, #tpu.memory_space<vmem>>, %arg3: memref<1x8x32xf32, #tpu.memory_space<vmem>>, %arg4: memref<32x32xf32, #tpu.memory_space<vmem>>, %arg5: memref<32x32xf32, #tpu.memory_space<vmem>>, %arg6: memref<32x32xf32, #tpu.memory_space<vmem>>, %arg7: memref<32x32xf32, #tpu.memory_space<vmem>>, %arg8: memref<8x8xf32, #tpu.memory_space<vmem>>, %arg9: memref<8x32xf32, #tpu.memory_space<vmem>>, %arg10: memref<3x8x32xf32, #tpu.memory_space<vmem>>, %arg11: memref<3x32x8xf32, #tpu.memory_space<vmem>>, %arg12: memref<8x32xf32, #tpu.memory_space<vmem>>) attributes {dimension_semantics = [#tpu.dimension_semantics<parallel>], iteration_bounds = array<i64: 2>, scalar_prefetch = 0 : i64, scratch_operands = 3 : i64, tpu.core_type = #tpu.core_type<tc>, window_params = [{transform_indices = @transform_0, window_bounds = array<i64: 1, 8, 32>}, {transform_indices = @transform_1, window_bounds = array<i64: 1, 8, 32>}, {transform_indices = @transform_2, window_bounds = array<i64: 1, 8, 32>}, {pipeline_mode = #tpu.pipeline_mode<synchronous>, transform_indices = @transform_3, window_bounds = array<i64: 32, 32>}, {pipeline_mode = #tpu.pipeline_mode<synchronous>, transform_indices = @transform_4, window_bounds = array<i64: 32, 32>}, {pipeline_mode = #tpu.pipeline_mode<synchronous>, transform_indices = @transform_5, window_bounds = array<i64: 32, 32>}, {pipeline_mode = #tpu.pipeline_mode<synchronous>, transform_indices = @transform_6, window_bounds = array<i64: 32, 32>}, {pipeline_mode = #tpu.pipeline_mode<synchronous>, transform_indices = @transform_7, window_bounds = array<i64: 8, 8>}, {transform_indices = @transform_8, window_bounds = array<i64: 8, 32>}]} {
    %c0 = arith.constant 0 : index
    %c0_0 = arith.constant 0 : index
    %c0_1 = arith.constant 0 : index
    %0 = vector.load %arg1[%c0, %c0_0, %c0_1] : memref<1x8x32xf32, #tpu.memory_space<vmem>>, vector<1x8x32xf32>
    %1 = vector.shape_cast %0 : vector<1x8x32xf32> to vector<8x32xf32>
    %c0_2 = arith.constant 0 : index
    %c0_3 = arith.constant 0 : index
    %2 = vector.load %arg4[%c0_2, %c0_3] : memref<32x32xf32, #tpu.memory_space<vmem>>, vector<32x32xf32>
    %cst = arith.constant dense<0.000000e+00> : vector<8x32xf32>
    %3 = tpu.matmul %1, %2, %cst {dimension_numbers = #tpu.dot_dimension_numbers<[1], [0], [0], [1], [0, 0, 1, 1], [], []>} : vector<8x32xf32>, vector<32x32xf32>, vector<8x32xf32> -> vector<8x32xf32>
    %c0_4 = arith.constant 0 : index
    %c0_5 = arith.constant 0 : index
    %c0_6 = arith.constant 0 : index
    %4 = vector.load %arg10[%c0_4, %c0_5, %c0_6] : memref<3x8x32xf32, #tpu.memory_space<vmem>>, vector<1x8x32xf32>
    %5 = vector.shape_cast %4 : vector<1x8x32xf32> to vector<8x32xf32>
    %6 = vector.shape_cast %3 : vector<8x32xf32> to vector<1x8x32xf32>
    tpu.vector_store %arg10[%c0_4, %c0_5, %c0_6], %6 {strides = array<i32>} : memref<3x8x32xf32, #tpu.memory_space<vmem>>, vector<1x8x32xf32>,
    %c0_7 = arith.constant 0 : index
    %c0_8 = arith.constant 0 : index
    %c0_9 = arith.constant 0 : index
    %7 = vector.load %arg2[%c0_7, %c0_8, %c0_9] : memref<1x8x32xf32, #tpu.memory_space<vmem>>, vector<1x8x32xf32>
    %8 = vector.shape_cast %7 : vector<1x8x32xf32> to vector<8x32xf32>
    %c0_10 = arith.constant 0 : index
    %c0_11 = arith.constant 0 : index
    %9 = vector.load %arg5[%c0_10, %c0_11] : memref<32x32xf32, #tpu.memory_space<vmem>>, vector<32x32xf32>
    %cst_12 = arith.constant dense<0.000000e+00> : vector<8x32xf32>
    %10 = tpu.matmul %8, %9, %cst_12 {dimension_numbers = #tpu.dot_dimension_numbers<[1], [0], [0], [1], [0, 0, 1, 1], [], []>} : vector<8x32xf32>, vector<32x32xf32>, vector<8x32xf32> -> vector<8x32xf32>
    %c1 = arith.constant 1 : index
    %c0_13 = arith.constant 0 : index
    %c0_14 = arith.constant 0 : index
    %11 = vector.load %arg10[%c1, %c0_13, %c0_14] : memref<3x8x32xf32, #tpu.memory_space<vmem>>, vector<1x8x32xf32>
    %12 = vector.shape_cast %11 : vector<1x8x32xf32> to vector<8x32xf32>
    %13 = vector.shape_cast %10 : vector<8x32xf32> to vector<1x8x32xf32>
    tpu.vector_store %arg10[%c1, %c0_13, %c0_14], %13 {strides = array<i32>} : memref<3x8x32xf32, #tpu.memory_space<vmem>>, vector<1x8x32xf32>,
    %c0_15 = arith.constant 0 : index
    %c0_16 = arith.constant 0 : index
    %c0_17 = arith.constant 0 : index
    %14 = vector.load %arg3[%c0_15, %c0_16, %c0_17] : memref<1x8x32xf32, #tpu.memory_space<vmem>>, vector<1x8x32xf32>
    %15 = vector.shape_cast %14 : vector<1x8x32xf32> to vector<8x32xf32>
    %c0_18 = arith.constant 0 : index
    %c0_19 = arith.constant 0 : index
    %16 = vector.load %arg6[%c0_18, %c0_19] : memref<32x32xf32, #tpu.memory_space<vmem>>, vector<32x32xf32>
    %cst_20 = arith.constant dense<0.000000e+00> : vector<8x32xf32>
    %17 = tpu.matmul %15, %16, %cst_20 {dimension_numbers = #tpu.dot_dimension_numbers<[1], [0], [0], [1], [0, 0, 1, 1], [], []>} : vector<8x32xf32>, vector<32x32xf32>, vector<8x32xf32> -> vector<8x32xf32>
    %c2 = arith.constant 2 : index
    %c0_21 = arith.constant 0 : index
    %c0_22 = arith.constant 0 : index
    %18 = vector.load %arg10[%c2, %c0_21, %c0_22] : memref<3x8x32xf32, #tpu.memory_space<vmem>>, vector<1x8x32xf32>
    %19 = vector.shape_cast %18 : vector<1x8x32xf32> to vector<8x32xf32>
    %20 = vector.shape_cast %17 : vector<8x32xf32> to vector<1x8x32xf32>
    tpu.vector_store %arg10[%c2, %c0_21, %c0_22], %20 {strides = array<i32>} : memref<3x8x32xf32, #tpu.memory_space<vmem>>, vector<1x8x32xf32>,
    %c0_23 = arith.constant 0 : index
    %c0_24 = arith.constant 0 : index
    %c0_25 = arith.constant 0 : index
    %21 = vector.load %arg10[%c0_23, %c0_24, %c0_25] : memref<3x8x32xf32, #tpu.memory_space<vmem>>, vector<1x2x8xf32>
    %22 = vector.shape_cast %21 : vector<1x2x8xf32> to vector<2x8xf32>
    %c0_26 = arith.constant 0 : index
    %c0_27 = arith.constant 0 : index
    %c0_28 = arith.constant 0 : index
    %23 = vector.load %arg11[%c0_26, %c0_27, %c0_28] : memref<3x32x8xf32, #tpu.memory_space<vmem>>, vector<1x2x8xf32>
    %24 = vector.shape_cast %23 : vector<1x2x8xf32> to vector<2x8xf32>
    %25 = vector.shape_cast %22 : vector<2x8xf32> to vector<1x2x8xf32>
    tpu.vector_store %arg11[%c0_26, %c0_27, %c0_28], %25 {strides = array<i32>} : memref<3x32x8xf32, #tpu.memory_space<vmem>>, vector<1x2x8xf32>,
    %c0_29 = arith.constant 0 : index
    %c0_30 = arith.constant 0 : index
    %c8 = arith.constant 8 : index
    %26 = vector.load %arg10[%c0_29, %c0_30, %c8] : memref<3x8x32xf32, #tpu.memory_space<vmem>>, vector<1x2x8xf32>
    %27 = vector.shape_cast %26 : vector<1x2x8xf32> to vector<2x8xf32>
    %c0_31 = arith.constant 0 : index
    %c2_32 = arith.constant 2 : index
    %c0_33 = arith.constant 0 : index
    %28 = vector.load %arg11[%c0_31, %c2_32, %c0_33] : memref<3x32x8xf32, #tpu.memory_space<vmem>>, vector<1x2x8xf32>
    %29 = vector.shape_cast %28 : vector<1x2x8xf32> to vector<2x8xf32>
    %30 = vector.shape_cast %27 : vector<2x8xf32> to vector<1x2x8xf32>
    tpu.vector_store %arg11[%c0_31, %c2_32, %c0_33], %30 {strides = array<i32>} : memref<3x32x8xf32, #tpu.memory_space<vmem>>, vector<1x2x8xf32>,
    %c0_34 = arith.constant 0 : index
    %c0_35 = arith.constant 0 : index
    %c16 = arith.constant 16 : index
    %31 = vector.load %arg10[%c0_34, %c0_35, %c16] : memref<3x8x32xf32, #tpu.memory_space<vmem>>, vector<1x2x8xf32>
    %32 = vector.shape_cast %31 : vector<1x2x8xf32> to vector<2x8xf32>
    %c0_36 = arith.constant 0 : index
    %c4 = arith.constant 4 : index
    %c0_37 = arith.constant 0 : index
    %33 = vector.load %arg11[%c0_36, %c4, %c0_37] : memref<3x32x8xf32, #tpu.memory_space<vmem>>, vector<1x2x8xf32>
    %34 = vector.shape_cast %33 : vector<1x2x8xf32> to vector<2x8xf32>
    %35 = vector.shape_cast %32 : vector<2x8xf32> to vector<1x2x8xf32>
    tpu.vector_store %arg11[%c0_36, %c4, %c0_37], %35 {strides = array<i32>} : memref<3x32x8xf32, #tpu.memory_space<vmem>>, vector<1x2x8xf32>,
    %c0_38 = arith.constant 0 : index
    %c0_39 = arith.constant 0 : index
    %c24 = arith.constant 24 : index
    %36 = vector.load %arg10[%c0_38, %c0_39, %c24] : memref<3x8x32xf32, #tpu.memory_space<vmem>>, vector<1x2x8xf32>
    %37 = vector.shape_cast %36 : vector<1x2x8xf32> to vector<2x8xf32>
    %c0_40 = arith.constant 0 : index
    %c6 = arith.constant 6 : index
    %c0_41 = arith.constant 0 : index
    %38 = vector.load %arg11[%c0_40, %c6, %c0_41] : memref<3x32x8xf32, #tpu.memory_space<vmem>>, vector<1x2x8xf32>
    %39 = vector.shape_cast %38 : vector<1x2x8xf32> to vector<2x8xf32>
    %40 = vector.shape_cast %37 : vector<2x8xf32> to vector<1x2x8xf32>
    tpu.vector_store %arg11[%c0_40, %c6, %c0_41], %40 {strides = array<i32>} : memref<3x32x8xf32, #tpu.memory_space<vmem>>, vector<1x2x8xf32>,
    %c0_42 = arith.constant 0 : index
    %c2_43 = arith.constant 2 : index
    %c0_44 = arith.constant 0 : index
    %41 = vector.load %arg10[%c0_42, %c2_43, %c0_44] : memref<3x8x32xf32, #tpu.memory_space<vmem>>, vector<1x2x8xf32>
    %42 = vector.shape_cast %41 : vector<1x2x8xf32> to vector<2x8xf32>
    %c0_45 = arith.constant 0 : index
    %c8_46 = arith.constant 8 : index
    %c0_47 = arith.constant 0 : index
    %43 = vector.load %arg11[%c0_45, %c8_46, %c0_47] : memref<3x32x8xf32, #tpu.memory_space<vmem>>, vector<1x2x8xf32>
    %44 = vector.shape_cast %43 : vector<1x2x8xf32> to vector<2x8xf32>
    %45 = vector.shape_cast %42 : vector<2x8xf32> to vector<1x2x8xf32>
    tpu.vector_store %arg11[%c0_45, %c8_46, %c0_47], %45 {strides = array<i32>} : memref<3x32x8xf32, #tpu.memory_space<vmem>>, vector<1x2x8xf32>,
    %c0_48 = arith.constant 0 : index
    %c2_49 = arith.constant 2 : index
    %c8_50 = arith.constant 8 : index
    %46 = vector.load %arg10[%c0_48, %c2_49, %c8_50] : memref<3x8x32xf32, #tpu.memory_space<vmem>>, vector<1x2x8xf32>
    %47 = vector.shape_cast %46 : vector<1x2x8xf32> to vector<2x8xf32>
    %c0_51 = arith.constant 0 : index
    %c10 = arith.constant 10 : index
    %c0_52 = arith.constant 0 : index
    %48 = vector.load %arg11[%c0_51, %c10, %c0_52] : memref<3x32x8xf32, #tpu.memory_space<vmem>>, vector<1x2x8xf32>
    %49 = vector.shape_cast %48 : vector<1x2x8xf32> to vector<2x8xf32>
    %50 = vector.shape_cast %47 : vector<2x8xf32> to vector<1x2x8xf32>
    tpu.vector_store %arg11[%c0_51, %c10, %c0_52], %50 {strides = array<i32>} : memref<3x32x8xf32, #tpu.memory_space<vmem>>, vector<1x2x8xf32>,
    %c0_53 = arith.constant 0 : index
    %c2_54 = arith.constant 2 : index
    %c16_55 = arith.constant 16 : index
    %51 = vector.load %arg10[%c0_53, %c2_54, %c16_55] : memref<3x8x32xf32, #tpu.memory_space<vmem>>, vector<1x2x8xf32>
    %52 = vector.shape_cast %51 : vector<1x2x8xf32> to vector<2x8xf32>
    %c0_56 = arith.constant 0 : index
    %c12 = arith.constant 12 : index
    %c0_57 = arith.constant 0 : index
    %53 = vector.load %arg11[%c0_56, %c12, %c0_57] : memref<3x32x8xf32, #tpu.memory_space<vmem>>, vector<1x2x8xf32>
    %54 = vector.shape_cast %53 : vector<1x2x8xf32> to vector<2x8xf32>
    %55 = vector.shape_cast %52 : vector<2x8xf32> to vector<1x2x8xf32>
    tpu.vector_store %arg11[%c0_56, %c12, %c0_57], %55 {strides = array<i32>} : memref<3x32x8xf32, #tpu.memory_space<vmem>>, vector<1x2x8xf32>,
    %c0_58 = arith.constant 0 : index
    %c2_59 = arith.constant 2 : index
    %c24_60 = arith.constant 24 : index
    %56 = vector.load %arg10[%c0_58, %c2_59, %c24_60] : memref<3x8x32xf32, #tpu.memory_space<vmem>>, vector<1x2x8xf32>
    %57 = vector.shape_cast %56 : vector<1x2x8xf32> to vector<2x8xf32>
    %c0_61 = arith.constant 0 : index
    %c14 = arith.constant 14 : index
    %c0_62 = arith.constant 0 : index
    %58 = vector.load %arg11[%c0_61, %c14, %c0_62] : memref<3x32x8xf32, #tpu.memory_space<vmem>>, vector<1x2x8xf32>
    %59 = vector.shape_cast %58 : vector<1x2x8xf32> to vector<2x8xf32>
    %60 = vector.shape_cast %57 : vector<2x8xf32> to vector<1x2x8xf32>
    tpu.vector_store %arg11[%c0_61, %c14, %c0_62], %60 {strides = array<i32>} : memref<3x32x8xf32, #tpu.memory_space<vmem>>, vector<1x2x8xf32>,
    %c0_63 = arith.constant 0 : index
    %c4_64 = arith.constant 4 : index
    %c0_65 = arith.constant 0 : index
    %61 = vector.load %arg10[%c0_63, %c4_64, %c0_65] : memref<3x8x32xf32, #tpu.memory_space<vmem>>, vector<1x2x8xf32>
    %62 = vector.shape_cast %61 : vector<1x2x8xf32> to vector<2x8xf32>
    %c0_66 = arith.constant 0 : index
    %c16_67 = arith.constant 16 : index
    %c0_68 = arith.constant 0 : index
    %63 = vector.load %arg11[%c0_66, %c16_67, %c0_68] : memref<3x32x8xf32, #tpu.memory_space<vmem>>, vector<1x2x8xf32>
    %64 = vector.shape_cast %63 : vector<1x2x8xf32> to vector<2x8xf32>
    %65 = vector.shape_cast %62 : vector<2x8xf32> to vector<1x2x8xf32>
    tpu.vector_store %arg11[%c0_66, %c16_67, %c0_68], %65 {strides = array<i32>} : memref<3x32x8xf32, #tpu.memory_space<vmem>>, vector<1x2x8xf32>,
    %c0_69 = arith.constant 0 : index
    %c4_70 = arith.constant 4 : index
    %c8_71 = arith.constant 8 : index
    %66 = vector.load %arg10[%c0_69, %c4_70, %c8_71] : memref<3x8x32xf32, #tpu.memory_space<vmem>>, vector<1x2x8xf32>
    %67 = vector.shape_cast %66 : vector<1x2x8xf32> to vector<2x8xf32>
    %c0_72 = arith.constant 0 : index
    %c18 = arith.constant 18 : index
    %c0_73 = arith.constant 0 : index
    %68 = vector.load %arg11[%c0_72, %c18, %c0_73] : memref<3x32x8xf32, #tpu.memory_space<vmem>>, vector<1x2x8xf32>
    %69 = vector.shape_cast %68 : vector<1x2x8xf32> to vector<2x8xf32>
    %70 = vector.shape_cast %67 : vector<2x8xf32> to vector<1x2x8xf32>
    tpu.vector_store %arg11[%c0_72, %c18, %c0_73], %70 {strides = array<i32>} : memref<3x32x8xf32, #tpu.memory_space<vmem>>, vector<1x2x8xf32>,
    %c0_74 = arith.constant 0 : index
    %c4_75 = arith.constant 4 : index
    %c16_76 = arith.constant 16 : index
    %71 = vector.load %arg10[%c0_74, %c4_75, %c16_76] : memref<3x8x32xf32, #tpu.memory_space<vmem>>, vector<1x2x8xf32>
    %72 = vector.shape_cast %71 : vector<1x2x8xf32> to vector<2x8xf32>
    %c0_77 = arith.constant 0 : index
    %c20 = arith.constant 20 : index
    %c0_78 = arith.constant 0 : index
    %73 = vector.load %arg11[%c0_77, %c20, %c0_78] : memref<3x32x8xf32, #tpu.memory_space<vmem>>, vector<1x2x8xf32>
    %74 = vector.shape_cast %73 : vector<1x2x8xf32> to vector<2x8xf32>
    %75 = vector.shape_cast %72 : vector<2x8xf32> to vector<1x2x8xf32>
    tpu.vector_store %arg11[%c0_77, %c20, %c0_78], %75 {strides = array<i32>} : memref<3x32x8xf32, #tpu.memory_space<vmem>>, vector<1x2x8xf32>,
    %c0_79 = arith.constant 0 : index
    %c4_80 = arith.constant 4 : index
    %c24_81 = arith.constant 24 : index
    %76 = vector.load %arg10[%c0_79, %c4_80, %c24_81] : memref<3x8x32xf32, #tpu.memory_space<vmem>>, vector<1x2x8xf32>
    %77 = vector.shape_cast %76 : vector<1x2x8xf32> to vector<2x8xf32>
    %c0_82 = arith.constant 0 : index
    %c22 = arith.constant 22 : index
    %c0_83 = arith.constant 0 : index
    %78 = vector.load %arg11[%c0_82, %c22, %c0_83] : memref<3x32x8xf32, #tpu.memory_space<vmem>>, vector<1x2x8xf32>
    %79 = vector.shape_cast %78 : vector<1x2x8xf32> to vector<2x8xf32>
    %80 = vector.shape_cast %77 : vector<2x8xf32> to vector<1x2x8xf32>
    tpu.vector_store %arg11[%c0_82, %c22, %c0_83], %80 {strides = array<i32>} : memref<3x32x8xf32, #tpu.memory_space<vmem>>, vector<1x2x8xf32>,
    %c0_84 = arith.constant 0 : index
    %c6_85 = arith.constant 6 : index
    %c0_86 = arith.constant 0 : index
    %81 = vector.load %arg10[%c0_84, %c6_85, %c0_86] : memref<3x8x32xf32, #tpu.memory_space<vmem>>, vector<1x2x8xf32>
    %82 = vector.shape_cast %81 : vector<1x2x8xf32> to vector<2x8xf32>
    %c0_87 = arith.constant 0 : index
    %c24_88 = arith.constant 24 : index
    %c0_89 = arith.constant 0 : index
    %83 = vector.load %arg11[%c0_87, %c24_88, %c0_89] : memref<3x32x8xf32, #tpu.memory_space<vmem>>, vector<1x2x8xf32>
    %84 = vector.shape_cast %83 : vector<1x2x8xf32> to vector<2x8xf32>
    %85 = vector.shape_cast %82 : vector<2x8xf32> to vector<1x2x8xf32>
    tpu.vector_store %arg11[%c0_87, %c24_88, %c0_89], %85 {strides = array<i32>} : memref<3x32x8xf32, #tpu.memory_space<vmem>>, vector<1x2x8xf32>,
    %c0_90 = arith.constant 0 : index
    %c6_91 = arith.constant 6 : index
    %c8_92 = arith.constant 8 : index
    %86 = vector.load %arg10[%c0_90, %c6_91, %c8_92] : memref<3x8x32xf32, #tpu.memory_space<vmem>>, vector<1x2x8xf32>
    %87 = vector.shape_cast %86 : vector<1x2x8xf32> to vector<2x8xf32>
    %c0_93 = arith.constant 0 : index
    %c26 = arith.constant 26 : index
    %c0_94 = arith.constant 0 : index
    %88 = vector.load %arg11[%c0_93, %c26, %c0_94] : memref<3x32x8xf32, #tpu.memory_space<vmem>>, vector<1x2x8xf32>
    %89 = vector.shape_cast %88 : vector<1x2x8xf32> to vector<2x8xf32>
    %90 = vector.shape_cast %87 : vector<2x8xf32> to vector<1x2x8xf32>
    tpu.vector_store %arg11[%c0_93, %c26, %c0_94], %90 {strides = array<i32>} : memref<3x32x8xf32, #tpu.memory_space<vmem>>, vector<1x2x8xf32>,
    %c0_95 = arith.constant 0 : index
    %c6_96 = arith.constant 6 : index
    %c16_97 = arith.constant 16 : index
    %91 = vector.load %arg10[%c0_95, %c6_96, %c16_97] : memref<3x8x32xf32, #tpu.memory_space<vmem>>, vector<1x2x8xf32>
    %92 = vector.shape_cast %91 : vector<1x2x8xf32> to vector<2x8xf32>
    %c0_98 = arith.constant 0 : index
    %c28 = arith.constant 28 : index
    %c0_99 = arith.constant 0 : index
    %93 = vector.load %arg11[%c0_98, %c28, %c0_99] : memref<3x32x8xf32, #tpu.memory_space<vmem>>, vector<1x2x8xf32>
    %94 = vector.shape_cast %93 : vector<1x2x8xf32> to vector<2x8xf32>
    %95 = vector.shape_cast %92 : vector<2x8xf32> to vector<1x2x8xf32>
    tpu.vector_store %arg11[%c0_98, %c28, %c0_99], %95 {strides = array<i32>} : memref<3x32x8xf32, #tpu.memory_space<vmem>>, vector<1x2x8xf32>,
    %c0_100 = arith.constant 0 : index
    %c6_101 = arith.constant 6 : index
    %c24_102 = arith.constant 24 : index
    %96 = vector.load %arg10[%c0_100, %c6_101, %c24_102] : memref<3x8x32xf32, #tpu.memory_space<vmem>>, vector<1x2x8xf32>
    %97 = vector.shape_cast %96 : vector<1x2x8xf32> to vector<2x8xf32>
    %c0_103 = arith.constant 0 : index
    %c30 = arith.constant 30 : index
    %c0_104 = arith.constant 0 : index
    %98 = vector.load %arg11[%c0_103, %c30, %c0_104] : memref<3x32x8xf32, #tpu.memory_space<vmem>>, vector<1x2x8xf32>
    %99 = vector.shape_cast %98 : vector<1x2x8xf32> to vector<2x8xf32>
    %100 = vector.shape_cast %97 : vector<2x8xf32> to vector<1x2x8xf32>
    tpu.vector_store %arg11[%c0_103, %c30, %c0_104], %100 {strides = array<i32>} : memref<3x32x8xf32, #tpu.memory_space<vmem>>, vector<1x2x8xf32>,
    %c1_105 = arith.constant 1 : index
    %c0_106 = arith.constant 0 : index
    %c0_107 = arith.constant 0 : index
    %101 = vector.load %arg10[%c1_105, %c0_106, %c0_107] : memref<3x8x32xf32, #tpu.memory_space<vmem>>, vector<1x2x8xf32>
    %102 = vector.shape_cast %101 : vector<1x2x8xf32> to vector<2x8xf32>
    %c1_108 = arith.constant 1 : index
    %c0_109 = arith.constant 0 : index
    %c0_110 = arith.constant 0 : index
    %103 = vector.load %arg11[%c1_108, %c0_109, %c0_110] : memref<3x32x8xf32, #tpu.memory_space<vmem>>, vector<1x2x8xf32>
    %104 = vector.shape_cast %103 : vector<1x2x8xf32> to vector<2x8xf32>
    %105 = vector.shape_cast %102 : vector<2x8xf32> to vector<1x2x8xf32>
    tpu.vector_store %arg11[%c1_108, %c0_109, %c0_110], %105 {strides = array<i32>} : memref<3x32x8xf32, #tpu.memory_space<vmem>>, vector<1x2x8xf32>,
    %c1_111 = arith.constant 1 : index
    %c0_112 = arith.constant 0 : index
    %c8_113 = arith.constant 8 : index
    %106 = vector.load %arg10[%c1_111, %c0_112, %c8_113] : memref<3x8x32xf32, #tpu.memory_space<vmem>>, vector<1x2x8xf32>
    %107 = vector.shape_cast %106 : vector<1x2x8xf32> to vector<2x8xf32>
    %c1_114 = arith.constant 1 : index
    %c2_115 = arith.constant 2 : index
    %c0_116 = arith.constant 0 : index
    %108 = vector.load %arg11[%c1_114, %c2_115, %c0_116] : memref<3x32x8xf32, #tpu.memory_space<vmem>>, vector<1x2x8xf32>
    %109 = vector.shape_cast %108 : vector<1x2x8xf32> to vector<2x8xf32>
    %110 = vector.shape_cast %107 : vector<2x8xf32> to vector<1x2x8xf32>
    tpu.vector_store %arg11[%c1_114, %c2_115, %c0_116], %110 {strides = array<i32>} : memref<3x32x8xf32, #tpu.memory_space<vmem>>, vector<1x2x8xf32>,
    %c1_117 = arith.constant 1 : index
    %c0_118 = arith.constant 0 : index
    %c16_119 = arith.constant 16 : index
    %111 = vector.load %arg10[%c1_117, %c0_118, %c16_119] : memref<3x8x32xf32, #tpu.memory_space<vmem>>, vector<1x2x8xf32>
    %112 = vector.shape_cast %111 : vector<1x2x8xf32> to vector<2x8xf32>
    %c1_120 = arith.constant 1 : index
    %c4_121 = arith.constant 4 : index
    %c0_122 = arith.constant 0 : index
    %113 = vector.load %arg11[%c1_120, %c4_121, %c0_122] : memref<3x32x8xf32, #tpu.memory_space<vmem>>, vector<1x2x8xf32>
    %114 = vector.shape_cast %113 : vector<1x2x8xf32> to vector<2x8xf32>
    %115 = vector.shape_cast %112 : vector<2x8xf32> to vector<1x2x8xf32>
    tpu.vector_store %arg11[%c1_120, %c4_121, %c0_122], %115 {strides = array<i32>} : memref<3x32x8xf32, #tpu.memory_space<vmem>>, vector<1x2x8xf32>,
    %c1_123 = arith.constant 1 : index
    %c0_124 = arith.constant 0 : index
    %c24_125 = arith.constant 24 : index
    %116 = vector.load %arg10[%c1_123, %c0_124, %c24_125] : memref<3x8x32xf32, #tpu.memory_space<vmem>>, vector<1x2x8xf32>
    %117 = vector.shape_cast %116 : vector<1x2x8xf32> to vector<2x8xf32>
    %c1_126 = arith.constant 1 : index
    %c6_127 = arith.constant 6 : index
    %c0_128 = arith.constant 0 : index
    %118 = vector.load %arg11[%c1_126, %c6_127, %c0_128] : memref<3x32x8xf32, #tpu.memory_space<vmem>>, vector<1x2x8xf32>
    %119 = vector.shape_cast %118 : vector<1x2x8xf32> to vector<2x8xf32>
    %120 = vector.shape_cast %117 : vector<2x8xf32> to vector<1x2x8xf32>
    tpu.vector_store %arg11[%c1_126, %c6_127, %c0_128], %120 {strides = array<i32>} : memref<3x32x8xf32, #tpu.memory_space<vmem>>, vector<1x2x8xf32>,
    %c1_129 = arith.constant 1 : index
    %c2_130 = arith.constant 2 : index
    %c0_131 = arith.constant 0 : index
    %121 = vector.load %arg10[%c1_129, %c2_130, %c0_131] : memref<3x8x32xf32, #tpu.memory_space<vmem>>, vector<1x2x8xf32>
    %122 = vector.shape_cast %121 : vector<1x2x8xf32> to vector<2x8xf32>
    %c1_132 = arith.constant 1 : index
    %c8_133 = arith.constant 8 : index
    %c0_134 = arith.constant 0 : index
    %123 = vector.load %arg11[%c1_132, %c8_133, %c0_134] : memref<3x32x8xf32, #tpu.memory_space<vmem>>, vector<1x2x8xf32>
    %124 = vector.shape_cast %123 : vector<1x2x8xf32> to vector<2x8xf32>
    %125 = vector.shape_cast %122 : vector<2x8xf32> to vector<1x2x8xf32>
    tpu.vector_store %arg11[%c1_132, %c8_133, %c0_134], %125 {strides = array<i32>} : memref<3x32x8xf32, #tpu.memory_space<vmem>>, vector<1x2x8xf32>,
    %c1_135 = arith.constant 1 : index
    %c2_136 = arith.constant 2 : index
    %c8_137 = arith.constant 8 : index
    %126 = vector.load %arg10[%c1_135, %c2_136, %c8_137] : memref<3x8x32xf32, #tpu.memory_space<vmem>>, vector<1x2x8xf32>
    %127 = vector.shape_cast %126 : vector<1x2x8xf32> to vector<2x8xf32>
    %c1_138 = arith.constant 1 : index
    %c10_139 = arith.constant 10 : index
    %c0_140 = arith.constant 0 : index
    %128 = vector.load %arg11[%c1_138, %c10_139, %c0_140] : memref<3x32x8xf32, #tpu.memory_space<vmem>>, vector<1x2x8xf32>
    %129 = vector.shape_cast %128 : vector<1x2x8xf32> to vector<2x8xf32>
    %130 = vector.shape_cast %127 : vector<2x8xf32> to vector<1x2x8xf32>
    tpu.vector_store %arg11[%c1_138, %c10_139, %c0_140], %130 {strides = array<i32>} : memref<3x32x8xf32, #tpu.memory_space<vmem>>, vector<1x2x8xf32>,
    %c1_141 = arith.constant 1 : index
    %c2_142 = arith.constant 2 : index
    %c16_143 = arith.constant 16 : index
    %131 = vector.load %arg10[%c1_141, %c2_142, %c16_143] : memref<3x8x32xf32, #tpu.memory_space<vmem>>, vector<1x2x8xf32>
    %132 = vector.shape_cast %131 : vector<1x2x8xf32> to vector<2x8xf32>
    %c1_144 = arith.constant 1 : index
    %c12_145 = arith.constant 12 : index
    %c0_146 = arith.constant 0 : index
    %133 = vector.load %arg11[%c1_144, %c12_145, %c0_146] : memref<3x32x8xf32, #tpu.memory_space<vmem>>, vector<1x2x8xf32>
    %134 = vector.shape_cast %133 : vector<1x2x8xf32> to vector<2x8xf32>
    %135 = vector.shape_cast %132 : vector<2x8xf32> to vector<1x2x8xf32>
    tpu.vector_store %arg11[%c1_144, %c12_145, %c0_146], %135 {strides = array<i32>} : memref<3x32x8xf32, #tpu.memory_space<vmem>>, vector<1x2x8xf32>,
    %c1_147 = arith.constant 1 : index
    %c2_148 = arith.constant 2 : index
    %c24_149 = arith.constant 24 : index
    %136 = vector.load %arg10[%c1_147, %c2_148, %c24_149] : memref<3x8x32xf32, #tpu.memory_space<vmem>>, vector<1x2x8xf32>
    %137 = vector.shape_cast %136 : vector<1x2x8xf32> to vector<2x8xf32>
    %c1_150 = arith.constant 1 : index
    %c14_151 = arith.constant 14 : index
    %c0_152 = arith.constant 0 : index
    %138 = vector.load %arg11[%c1_150, %c14_151, %c0_152] : memref<3x32x8xf32, #tpu.memory_space<vmem>>, vector<1x2x8xf32>
    %139 = vector.shape_cast %138 : vector<1x2x8xf32> to vector<2x8xf32>
    %140 = vector.shape_cast %137 : vector<2x8xf32> to vector<1x2x8xf32>
    tpu.vector_store %arg11[%c1_150, %c14_151, %c0_152], %140 {strides = array<i32>} : memref<3x32x8xf32, #tpu.memory_space<vmem>>, vector<1x2x8xf32>,
    %c1_153 = arith.constant 1 : index
    %c4_154 = arith.constant 4 : index
    %c0_155 = arith.constant 0 : index
    %141 = vector.load %arg10[%c1_153, %c4_154, %c0_155] : memref<3x8x32xf32, #tpu.memory_space<vmem>>, vector<1x2x8xf32>
    %142 = vector.shape_cast %141 : vector<1x2x8xf32> to vector<2x8xf32>
    %c1_156 = arith.constant 1 : index
    %c16_157 = arith.constant 16 : index
    %c0_158 = arith.constant 0 : index
    %143 = vector.load %arg11[%c1_156, %c16_157, %c0_158] : memref<3x32x8xf32, #tpu.memory_space<vmem>>, vector<1x2x8xf32>
    %144 = vector.shape_cast %143 : vector<1x2x8xf32> to vector<2x8xf32>
    %145 = vector.shape_cast %142 : vector<2x8xf32> to vector<1x2x8xf32>
    tpu.vector_store %arg11[%c1_156, %c16_157, %c0_158], %145 {strides = array<i32>} : memref<3x32x8xf32, #tpu.memory_space<vmem>>, vector<1x2x8xf32>,
    %c1_159 = arith.constant 1 : index
    %c4_160 = arith.constant 4 : index
    %c8_161 = arith.constant 8 : index
    %146 = vector.load %arg10[%c1_159, %c4_160, %c8_161] : memref<3x8x32xf32, #tpu.memory_space<vmem>>, vector<1x2x8xf32>
    %147 = vector.shape_cast %146 : vector<1x2x8xf32> to vector<2x8xf32>
    %c1_162 = arith.constant 1 : index
    %c18_163 = arith.constant 18 : index
    %c0_164 = arith.constant 0 : index
    %148 = vector.load %arg11[%c1_162, %c18_163, %c0_164] : memref<3x32x8xf32, #tpu.memory_space<vmem>>, vector<1x2x8xf32>
    %149 = vector.shape_cast %148 : vector<1x2x8xf32> to vector<2x8xf32>
    %150 = vector.shape_cast %147 : vector<2x8xf32> to vector<1x2x8xf32>
    tpu.vector_store %arg11[%c1_162, %c18_163, %c0_164], %150 {strides = array<i32>} : memref<3x32x8xf32, #tpu.memory_space<vmem>>, vector<1x2x8xf32>,
    %c1_165 = arith.constant 1 : index
    %c4_166 = arith.constant 4 : index
    %c16_167 = arith.constant 16 : index
    %151 = vector.load %arg10[%c1_165, %c4_166, %c16_167] : memref<3x8x32xf32, #tpu.memory_space<vmem>>, vector<1x2x8xf32>
    %152 = vector.shape_cast %151 : vector<1x2x8xf32> to vector<2x8xf32>
    %c1_168 = arith.constant 1 : index
    %c20_169 = arith.constant 20 : index
    %c0_170 = arith.constant 0 : index
    %153 = vector.load %arg11[%c1_168, %c20_169, %c0_170] : memref<3x32x8xf32, #tpu.memory_space<vmem>>, vector<1x2x8xf32>
    %154 = vector.shape_cast %153 : vector<1x2x8xf32> to vector<2x8xf32>
    %155 = vector.shape_cast %152 : vector<2x8xf32> to vector<1x2x8xf32>
    tpu.vector_store %arg11[%c1_168, %c20_169, %c0_170], %155 {strides = array<i32>} : memref<3x32x8xf32, #tpu.memory_space<vmem>>, vector<1x2x8xf32>,
    %c1_171 = arith.constant 1 : index
    %c4_172 = arith.constant 4 : index
    %c24_173 = arith.constant 24 : index
    %156 = vector.load %arg10[%c1_171, %c4_172, %c24_173] : memref<3x8x32xf32, #tpu.memory_space<vmem>>, vector<1x2x8xf32>
    %157 = vector.shape_cast %156 : vector<1x2x8xf32> to vector<2x8xf32>
    %c1_174 = arith.constant 1 : index
    %c22_175 = arith.constant 22 : index
    %c0_176 = arith.constant 0 : index
    %158 = vector.load %arg11[%c1_174, %c22_175, %c0_176] : memref<3x32x8xf32, #tpu.memory_space<vmem>>, vector<1x2x8xf32>
    %159 = vector.shape_cast %158 : vector<1x2x8xf32> to vector<2x8xf32>
    %160 = vector.shape_cast %157 : vector<2x8xf32> to vector<1x2x8xf32>
    tpu.vector_store %arg11[%c1_174, %c22_175, %c0_176], %160 {strides = array<i32>} : memref<3x32x8xf32, #tpu.memory_space<vmem>>, vector<1x2x8xf32>,
    %c1_177 = arith.constant 1 : index
    %c6_178 = arith.constant 6 : index
    %c0_179 = arith.constant 0 : index
    %161 = vector.load %arg10[%c1_177, %c6_178, %c0_179] : memref<3x8x32xf32, #tpu.memory_space<vmem>>, vector<1x2x8xf32>
    %162 = vector.shape_cast %161 : vector<1x2x8xf32> to vector<2x8xf32>
    %c1_180 = arith.constant 1 : index
    %c24_181 = arith.constant 24 : index
    %c0_182 = arith.constant 0 : index
    %163 = vector.load %arg11[%c1_180, %c24_181, %c0_182] : memref<3x32x8xf32, #tpu.memory_space<vmem>>, vector<1x2x8xf32>
    %164 = vector.shape_cast %163 : vector<1x2x8xf32> to vector<2x8xf32>
    %165 = vector.shape_cast %162 : vector<2x8xf32> to vector<1x2x8xf32>
    tpu.vector_store %arg11[%c1_180, %c24_181, %c0_182], %165 {strides = array<i32>} : memref<3x32x8xf32, #tpu.memory_space<vmem>>, vector<1x2x8xf32>,
    %c1_183 = arith.constant 1 : index
    %c6_184 = arith.constant 6 : index
    %c8_185 = arith.constant 8 : index
    %166 = vector.load %arg10[%c1_183, %c6_184, %c8_185] : memref<3x8x32xf32, #tpu.memory_space<vmem>>, vector<1x2x8xf32>
    %167 = vector.shape_cast %166 : vector<1x2x8xf32> to vector<2x8xf32>
    %c1_186 = arith.constant 1 : index
    %c26_187 = arith.constant 26 : index
    %c0_188 = arith.constant 0 : index
    %168 = vector.load %arg11[%c1_186, %c26_187, %c0_188] : memref<3x32x8xf32, #tpu.memory_space<vmem>>, vector<1x2x8xf32>
    %169 = vector.shape_cast %168 : vector<1x2x8xf32> to vector<2x8xf32>
    %170 = vector.shape_cast %167 : vector<2x8xf32> to vector<1x2x8xf32>
    tpu.vector_store %arg11[%c1_186, %c26_187, %c0_188], %170 {strides = array<i32>} : memref<3x32x8xf32, #tpu.memory_space<vmem>>, vector<1x2x8xf32>,
    %c1_189 = arith.constant 1 : index
    %c6_190 = arith.constant 6 : index
    %c16_191 = arith.constant 16 : index
    %171 = vector.load %arg10[%c1_189, %c6_190, %c16_191] : memref<3x8x32xf32, #tpu.memory_space<vmem>>, vector<1x2x8xf32>
    %172 = vector.shape_cast %171 : vector<1x2x8xf32> to vector<2x8xf32>
    %c1_192 = arith.constant 1 : index
    %c28_193 = arith.constant 28 : index
    %c0_194 = arith.constant 0 : index
    %173 = vector.load %arg11[%c1_192, %c28_193, %c0_194] : memref<3x32x8xf32, #tpu.memory_space<vmem>>, vector<1x2x8xf32>
    %174 = vector.shape_cast %173 : vector<1x2x8xf32> to vector<2x8xf32>
    %175 = vector.shape_cast %172 : vector<2x8xf32> to vector<1x2x8xf32>
    tpu.vector_store %arg11[%c1_192, %c28_193, %c0_194], %175 {strides = array<i32>} : memref<3x32x8xf32, #tpu.memory_space<vmem>>, vector<1x2x8xf32>,
    %c1_195 = arith.constant 1 : index
    %c6_196 = arith.constant 6 : index
    %c24_197 = arith.constant 24 : index
    %176 = vector.load %arg10[%c1_195, %c6_196, %c24_197] : memref<3x8x32xf32, #tpu.memory_space<vmem>>, vector<1x2x8xf32>
    %177 = vector.shape_cast %176 : vector<1x2x8xf32> to vector<2x8xf32>
    %c1_198 = arith.constant 1 : index
    %c30_199 = arith.constant 30 : index
    %c0_200 = arith.constant 0 : index
    %178 = vector.load %arg11[%c1_198, %c30_199, %c0_200] : memref<3x32x8xf32, #tpu.memory_space<vmem>>, vector<1x2x8xf32>
    %179 = vector.shape_cast %178 : vector<1x2x8xf32> to vector<2x8xf32>
    %180 = vector.shape_cast %177 : vector<2x8xf32> to vector<1x2x8xf32>
    tpu.vector_store %arg11[%c1_198, %c30_199, %c0_200], %180 {strides = array<i32>} : memref<3x32x8xf32, #tpu.memory_space<vmem>>, vector<1x2x8xf32>,
    %c2_201 = arith.constant 2 : index
    %c0_202 = arith.constant 0 : index
    %c0_203 = arith.constant 0 : index
    %181 = vector.load %arg10[%c2_201, %c0_202, %c0_203] : memref<3x8x32xf32, #tpu.memory_space<vmem>>, vector<1x2x8xf32>
    %182 = vector.shape_cast %181 : vector<1x2x8xf32> to vector<2x8xf32>
    %c2_204 = arith.constant 2 : index
    %c0_205 = arith.constant 0 : index
    %c0_206 = arith.constant 0 : index
    %183 = vector.load %arg11[%c2_204, %c0_205, %c0_206] : memref<3x32x8xf32, #tpu.memory_space<vmem>>, vector<1x2x8xf32>
    %184 = vector.shape_cast %183 : vector<1x2x8xf32> to vector<2x8xf32>
    %185 = vector.shape_cast %182 : vector<2x8xf32> to vector<1x2x8xf32>
    tpu.vector_store %arg11[%c2_204, %c0_205, %c0_206], %185 {strides = array<i32>} : memref<3x32x8xf32, #tpu.memory_space<vmem>>, vector<1x2x8xf32>,
    %c2_207 = arith.constant 2 : index
    %c0_208 = arith.constant 0 : index
    %c8_209 = arith.constant 8 : index
    %186 = vector.load %arg10[%c2_207, %c0_208, %c8_209] : memref<3x8x32xf32, #tpu.memory_space<vmem>>, vector<1x2x8xf32>
    %187 = vector.shape_cast %186 : vector<1x2x8xf32> to vector<2x8xf32>
    %c2_210 = arith.constant 2 : index
    %c2_211 = arith.constant 2 : index
    %c0_212 = arith.constant 0 : index
    %188 = vector.load %arg11[%c2_210, %c2_211, %c0_212] : memref<3x32x8xf32, #tpu.memory_space<vmem>>, vector<1x2x8xf32>
    %189 = vector.shape_cast %188 : vector<1x2x8xf32> to vector<2x8xf32>
    %190 = vector.shape_cast %187 : vector<2x8xf32> to vector<1x2x8xf32>
    tpu.vector_store %arg11[%c2_210, %c2_211, %c0_212], %190 {strides = array<i32>} : memref<3x32x8xf32, #tpu.memory_space<vmem>>, vector<1x2x8xf32>,
    %c2_213 = arith.constant 2 : index
    %c0_214 = arith.constant 0 : index
    %c16_215 = arith.constant 16 : index
    %191 = vector.load %arg10[%c2_213, %c0_214, %c16_215] : memref<3x8x32xf32, #tpu.memory_space<vmem>>, vector<1x2x8xf32>
    %192 = vector.shape_cast %191 : vector<1x2x8xf32> to vector<2x8xf32>
    %c2_216 = arith.constant 2 : index
    %c4_217 = arith.constant 4 : index
    %c0_218 = arith.constant 0 : index
    %193 = vector.load %arg11[%c2_216, %c4_217, %c0_218] : memref<3x32x8xf32, #tpu.memory_space<vmem>>, vector<1x2x8xf32>
    %194 = vector.shape_cast %193 : vector<1x2x8xf32> to vector<2x8xf32>
    %195 = vector.shape_cast %192 : vector<2x8xf32> to vector<1x2x8xf32>
    tpu.vector_store %arg11[%c2_216, %c4_217, %c0_218], %195 {strides = array<i32>} : memref<3x32x8xf32, #tpu.memory_space<vmem>>, vector<1x2x8xf32>,
    %c2_219 = arith.constant 2 : index
    %c0_220 = arith.constant 0 : index
    %c24_221 = arith.constant 24 : index
    %196 = vector.load %arg10[%c2_219, %c0_220, %c24_221] : memref<3x8x32xf32, #tpu.memory_space<vmem>>, vector<1x2x8xf32>
    %197 = vector.shape_cast %196 : vector<1x2x8xf32> to vector<2x8xf32>
    %c2_222 = arith.constant 2 : index
    %c6_223 = arith.constant 6 : index
    %c0_224 = arith.constant 0 : index
    %198 = vector.load %arg11[%c2_222, %c6_223, %c0_224] : memref<3x32x8xf32, #tpu.memory_space<vmem>>, vector<1x2x8xf32>
    %199 = vector.shape_cast %198 : vector<1x2x8xf32> to vector<2x8xf32>
    %200 = vector.shape_cast %197 : vector<2x8xf32> to vector<1x2x8xf32>
    tpu.vector_store %arg11[%c2_222, %c6_223, %c0_224], %200 {strides = array<i32>} : memref<3x32x8xf32, #tpu.memory_space<vmem>>, vector<1x2x8xf32>,
    %c2_225 = arith.constant 2 : index
    %c2_226 = arith.constant 2 : index
    %c0_227 = arith.constant 0 : index
    %201 = vector.load %arg10[%c2_225, %c2_226, %c0_227] : memref<3x8x32xf32, #tpu.memory_space<vmem>>, vector<1x2x8xf32>
    %202 = vector.shape_cast %201 : vector<1x2x8xf32> to vector<2x8xf32>
    %c2_228 = arith.constant 2 : index
    %c8_229 = arith.constant 8 : index
    %c0_230 = arith.constant 0 : index
    %203 = vector.load %arg11[%c2_228, %c8_229, %c0_230] : memref<3x32x8xf32, #tpu.memory_space<vmem>>, vector<1x2x8xf32>
    %204 = vector.shape_cast %203 : vector<1x2x8xf32> to vector<2x8xf32>
    %205 = vector.shape_cast %202 : vector<2x8xf32> to vector<1x2x8xf32>
    tpu.vector_store %arg11[%c2_228, %c8_229, %c0_230], %205 {strides = array<i32>} : memref<3x32x8xf32, #tpu.memory_space<vmem>>, vector<1x2x8xf32>,
    %c2_231 = arith.constant 2 : index
    %c2_232 = arith.constant 2 : index
    %c8_233 = arith.constant 8 : index
    %206 = vector.load %arg10[%c2_231, %c2_232, %c8_233] : memref<3x8x32xf32, #tpu.memory_space<vmem>>, vector<1x2x8xf32>
    %207 = vector.shape_cast %206 : vector<1x2x8xf32> to vector<2x8xf32>
    %c2_234 = arith.constant 2 : index
    %c10_235 = arith.constant 10 : index
    %c0_236 = arith.constant 0 : index
    %208 = vector.load %arg11[%c2_234, %c10_235, %c0_236] : memref<3x32x8xf32, #tpu.memory_space<vmem>>, vector<1x2x8xf32>
    %209 = vector.shape_cast %208 : vector<1x2x8xf32> to vector<2x8xf32>
    %210 = vector.shape_cast %207 : vector<2x8xf32> to vector<1x2x8xf32>
    tpu.vector_store %arg11[%c2_234, %c10_235, %c0_236], %210 {strides = array<i32>} : memref<3x32x8xf32, #tpu.memory_space<vmem>>, vector<1x2x8xf32>,
    %c2_237 = arith.constant 2 : index
    %c2_238 = arith.constant 2 : index
    %c16_239 = arith.constant 16 : index
    %211 = vector.load %arg10[%c2_237, %c2_238, %c16_239] : memref<3x8x32xf32, #tpu.memory_space<vmem>>, vector<1x2x8xf32>
    %212 = vector.shape_cast %211 : vector<1x2x8xf32> to vector<2x8xf32>
    %c2_240 = arith.constant 2 : index
    %c12_241 = arith.constant 12 : index
    %c0_242 = arith.constant 0 : index
    %213 = vector.load %arg11[%c2_240, %c12_241, %c0_242] : memref<3x32x8xf32, #tpu.memory_space<vmem>>, vector<1x2x8xf32>
    %214 = vector.shape_cast %213 : vector<1x2x8xf32> to vector<2x8xf32>
    %215 = vector.shape_cast %212 : vector<2x8xf32> to vector<1x2x8xf32>
    tpu.vector_store %arg11[%c2_240, %c12_241, %c0_242], %215 {strides = array<i32>} : memref<3x32x8xf32, #tpu.memory_space<vmem>>, vector<1x2x8xf32>,
    %c2_243 = arith.constant 2 : index
    %c2_244 = arith.constant 2 : index
    %c24_245 = arith.constant 24 : index
    %216 = vector.load %arg10[%c2_243, %c2_244, %c24_245] : memref<3x8x32xf32, #tpu.memory_space<vmem>>, vector<1x2x8xf32>
    %217 = vector.shape_cast %216 : vector<1x2x8xf32> to vector<2x8xf32>
    %c2_246 = arith.constant 2 : index
    %c14_247 = arith.constant 14 : index
    %c0_248 = arith.constant 0 : index
    %218 = vector.load %arg11[%c2_246, %c14_247, %c0_248] : memref<3x32x8xf32, #tpu.memory_space<vmem>>, vector<1x2x8xf32>
    %219 = vector.shape_cast %218 : vector<1x2x8xf32> to vector<2x8xf32>
    %220 = vector.shape_cast %217 : vector<2x8xf32> to vector<1x2x8xf32>
    tpu.vector_store %arg11[%c2_246, %c14_247, %c0_248], %220 {strides = array<i32>} : memref<3x32x8xf32, #tpu.memory_space<vmem>>, vector<1x2x8xf32>,
    %c2_249 = arith.constant 2 : index
    %c4_250 = arith.constant 4 : index
    %c0_251 = arith.constant 0 : index
    %221 = vector.load %arg10[%c2_249, %c4_250, %c0_251] : memref<3x8x32xf32, #tpu.memory_space<vmem>>, vector<1x2x8xf32>
    %222 = vector.shape_cast %221 : vector<1x2x8xf32> to vector<2x8xf32>
    %c2_252 = arith.constant 2 : index
    %c16_253 = arith.constant 16 : index
    %c0_254 = arith.constant 0 : index
    %223 = vector.load %arg11[%c2_252, %c16_253, %c0_254] : memref<3x32x8xf32, #tpu.memory_space<vmem>>, vector<1x2x8xf32>
    %224 = vector.shape_cast %223 : vector<1x2x8xf32> to vector<2x8xf32>
    %225 = vector.shape_cast %222 : vector<2x8xf32> to vector<1x2x8xf32>
    tpu.vector_store %arg11[%c2_252, %c16_253, %c0_254], %225 {strides = array<i32>} : memref<3x32x8xf32, #tpu.memory_space<vmem>>, vector<1x2x8xf32>,
    %c2_255 = arith.constant 2 : index
    %c4_256 = arith.constant 4 : index
    %c8_257 = arith.constant 8 : index
    %226 = vector.load %arg10[%c2_255, %c4_256, %c8_257] : memref<3x8x32xf32, #tpu.memory_space<vmem>>, vector<1x2x8xf32>
    %227 = vector.shape_cast %226 : vector<1x2x8xf32> to vector<2x8xf32>
    %c2_258 = arith.constant 2 : index
    %c18_259 = arith.constant 18 : index
    %c0_260 = arith.constant 0 : index
    %228 = vector.load %arg11[%c2_258, %c18_259, %c0_260] : memref<3x32x8xf32, #tpu.memory_space<vmem>>, vector<1x2x8xf32>
    %229 = vector.shape_cast %228 : vector<1x2x8xf32> to vector<2x8xf32>
    %230 = vector.shape_cast %227 : vector<2x8xf32> to vector<1x2x8xf32>
    tpu.vector_store %arg11[%c2_258, %c18_259, %c0_260], %230 {strides = array<i32>} : memref<3x32x8xf32, #tpu.memory_space<vmem>>, vector<1x2x8xf32>,
    %c2_261 = arith.constant 2 : index
    %c4_262 = arith.constant 4 : index
    %c16_263 = arith.constant 16 : index
    %231 = vector.load %arg10[%c2_261, %c4_262, %c16_263] : memref<3x8x32xf32, #tpu.memory_space<vmem>>, vector<1x2x8xf32>
    %232 = vector.shape_cast %231 : vector<1x2x8xf32> to vector<2x8xf32>
    %c2_264 = arith.constant 2 : index
    %c20_265 = arith.constant 20 : index
    %c0_266 = arith.constant 0 : index
    %233 = vector.load %arg11[%c2_264, %c20_265, %c0_266] : memref<3x32x8xf32, #tpu.memory_space<vmem>>, vector<1x2x8xf32>
    %234 = vector.shape_cast %233 : vector<1x2x8xf32> to vector<2x8xf32>
    %235 = vector.shape_cast %232 : vector<2x8xf32> to vector<1x2x8xf32>
    tpu.vector_store %arg11[%c2_264, %c20_265, %c0_266], %235 {strides = array<i32>} : memref<3x32x8xf32, #tpu.memory_space<vmem>>, vector<1x2x8xf32>,
    %c2_267 = arith.constant 2 : index
    %c4_268 = arith.constant 4 : index
    %c24_269 = arith.constant 24 : index
    %236 = vector.load %arg10[%c2_267, %c4_268, %c24_269] : memref<3x8x32xf32, #tpu.memory_space<vmem>>, vector<1x2x8xf32>
    %237 = vector.shape_cast %236 : vector<1x2x8xf32> to vector<2x8xf32>
    %c2_270 = arith.constant 2 : index
    %c22_271 = arith.constant 22 : index
    %c0_272 = arith.constant 0 : index
    %238 = vector.load %arg11[%c2_270, %c22_271, %c0_272] : memref<3x32x8xf32, #tpu.memory_space<vmem>>, vector<1x2x8xf32>
    %239 = vector.shape_cast %238 : vector<1x2x8xf32> to vector<2x8xf32>
    %240 = vector.shape_cast %237 : vector<2x8xf32> to vector<1x2x8xf32>
    tpu.vector_store %arg11[%c2_270, %c22_271, %c0_272], %240 {strides = array<i32>} : memref<3x32x8xf32, #tpu.memory_space<vmem>>, vector<1x2x8xf32>,
    %c2_273 = arith.constant 2 : index
    %c6_274 = arith.constant 6 : index
    %c0_275 = arith.constant 0 : index
    %241 = vector.load %arg10[%c2_273, %c6_274, %c0_275] : memref<3x8x32xf32, #tpu.memory_space<vmem>>, vector<1x2x8xf32>
    %242 = vector.shape_cast %241 : vector<1x2x8xf32> to vector<2x8xf32>
    %c2_276 = arith.constant 2 : index
    %c24_277 = arith.constant 24 : index
    %c0_278 = arith.constant 0 : index
    %243 = vector.load %arg11[%c2_276, %c24_277, %c0_278] : memref<3x32x8xf32, #tpu.memory_space<vmem>>, vector<1x2x8xf32>
    %244 = vector.shape_cast %243 : vector<1x2x8xf32> to vector<2x8xf32>
    %245 = vector.shape_cast %242 : vector<2x8xf32> to vector<1x2x8xf32>
    tpu.vector_store %arg11[%c2_276, %c24_277, %c0_278], %245 {strides = array<i32>} : memref<3x32x8xf32, #tpu.memory_space<vmem>>, vector<1x2x8xf32>,
    %c2_279 = arith.constant 2 : index
    %c6_280 = arith.constant 6 : index
    %c8_281 = arith.constant 8 : index
    %246 = vector.load %arg10[%c2_279, %c6_280, %c8_281] : memref<3x8x32xf32, #tpu.memory_space<vmem>>, vector<1x2x8xf32>
    %247 = vector.shape_cast %246 : vector<1x2x8xf32> to vector<2x8xf32>
    %c2_282 = arith.constant 2 : index
    %c26_283 = arith.constant 26 : index
    %c0_284 = arith.constant 0 : index
    %248 = vector.load %arg11[%c2_282, %c26_283, %c0_284] : memref<3x32x8xf32, #tpu.memory_space<vmem>>, vector<1x2x8xf32>
    %249 = vector.shape_cast %248 : vector<1x2x8xf32> to vector<2x8xf32>
    %250 = vector.shape_cast %247 : vector<2x8xf32> to vector<1x2x8xf32>
    tpu.vector_store %arg11[%c2_282, %c26_283, %c0_284], %250 {strides = array<i32>} : memref<3x32x8xf32, #tpu.memory_space<vmem>>, vector<1x2x8xf32>,
    %c2_285 = arith.constant 2 : index
    %c6_286 = arith.constant 6 : index
    %c16_287 = arith.constant 16 : index
    %251 = vector.load %arg10[%c2_285, %c6_286, %c16_287] : memref<3x8x32xf32, #tpu.memory_space<vmem>>, vector<1x2x8xf32>
    %252 = vector.shape_cast %251 : vector<1x2x8xf32> to vector<2x8xf32>
    %c2_288 = arith.constant 2 : index
    %c28_289 = arith.constant 28 : index
    %c0_290 = arith.constant 0 : index
    %253 = vector.load %arg11[%c2_288, %c28_289, %c0_290] : memref<3x32x8xf32, #tpu.memory_space<vmem>>, vector<1x2x8xf32>
    %254 = vector.shape_cast %253 : vector<1x2x8xf32> to vector<2x8xf32>
    %255 = vector.shape_cast %252 : vector<2x8xf32> to vector<1x2x8xf32>
    tpu.vector_store %arg11[%c2_288, %c28_289, %c0_290], %255 {strides = array<i32>} : memref<3x32x8xf32, #tpu.memory_space<vmem>>, vector<1x2x8xf32>,
    %c2_291 = arith.constant 2 : index
    %c6_292 = arith.constant 6 : index
    %c24_293 = arith.constant 24 : index
    %256 = vector.load %arg10[%c2_291, %c6_292, %c24_293] : memref<3x8x32xf32, #tpu.memory_space<vmem>>, vector<1x2x8xf32>
    %257 = vector.shape_cast %256 : vector<1x2x8xf32> to vector<2x8xf32>
    %c2_294 = arith.constant 2 : index
    %c30_295 = arith.constant 30 : index
    %c0_296 = arith.constant 0 : index
    %258 = vector.load %arg11[%c2_294, %c30_295, %c0_296] : memref<3x32x8xf32, #tpu.memory_space<vmem>>, vector<1x2x8xf32>
    %259 = vector.shape_cast %258 : vector<1x2x8xf32> to vector<2x8xf32>
    %260 = vector.shape_cast %257 : vector<2x8xf32> to vector<1x2x8xf32>
    tpu.vector_store %arg11[%c2_294, %c30_295, %c0_296], %260 {strides = array<i32>} : memref<3x32x8xf32, #tpu.memory_space<vmem>>, vector<1x2x8xf32>,
    %c0_297 = arith.constant 0 : index
    %c0_298 = arith.constant 0 : index
    %c0_299 = arith.constant 0 : index
    %261 = vector.load %arg11[%c0_297, %c0_298, %c0_299] : memref<3x32x8xf32, #tpu.memory_space<vmem>>, vector<1x8x8xf32>
    %262 = vector.shape_cast %261 : vector<1x8x8xf32> to vector<8x8xf32>
    %cst_300 = arith.constant 0.353553385 : f32
    %263 = vector.broadcast %cst_300 : f32 to vector<8x8xf32>
    %264 = arith.mulf %262, %263 : vector<8x8xf32>
    %c1_301 = arith.constant 1 : index
    %c0_302 = arith.constant 0 : index
    %c0_303 = arith.constant 0 : index
    %265 = vector.load %arg11[%c1_301, %c0_302, %c0_303] : memref<3x32x8xf32, #tpu.memory_space<vmem>>, vector<1x8x8xf32>
    %266 = vector.shape_cast %265 : vector<1x8x8xf32> to vector<8x8xf32>
    %c2_304 = arith.constant 2 : index
    %c0_305 = arith.constant 0 : index
    %c0_306 = arith.constant 0 : index
    %267 = vector.load %arg11[%c2_304, %c0_305, %c0_306] : memref<3x32x8xf32, #tpu.memory_space<vmem>>, vector<1x8x8xf32>
    %268 = vector.shape_cast %267 : vector<1x8x8xf32> to vector<8x8xf32>
    %cst_307 = arith.constant dense<0.000000e+00> : vector<8x8xf32>
    %269 = tpu.matmul %264, %266, %cst_307 {dimension_numbers = #tpu.dot_dimension_numbers<[1], [1], [0], [0], [0, 0, 1, 0], [], []>} : vector<8x8xf32>, vector<8x8xf32>, vector<8x8xf32> -> vector<8x8xf32>
    %cst_308 = arith.constant dense<0xFF800000> : vector<8xf32>
    %270 = vector.multi_reduction <maximumf>, %269, %cst_308 [1] : vector<8x8xf32> to vector<8xf32>
    %271 = vector.shape_cast %270 : vector<8xf32> to vector<8x1xf32>
    %272 = vector.broadcast %271 : vector<8x1xf32> to vector<8x8xf32>
    %273 = arith.subf %269, %272 : vector<8x8xf32>
    %274 = math.exp %273 : vector<8x8xf32>
    %cst_309 = arith.constant dense<0.000000e+00> : vector<8xf32>
    %275 = vector.multi_reduction <add>, %274, %cst_309 [1] : vector<8x8xf32> to vector<8xf32>
    %276 = vector.shape_cast %275 : vector<8xf32> to vector<8x1xf32>
    %277 = tpu.reciprocal %276 {approx = true} : vector<8x1xf32> -> vector<8x1xf32>
    %278 = vector.broadcast %277 : vector<8x1xf32> to vector<8x8xf32>
    %279 = arith.mulf %274, %278 : vector<8x8xf32>
    %cst_310 = arith.constant dense<0.000000e+00> : vector<8x8xf32>
    %280 = tpu.matmul %279, %268, %cst_310 {dimension_numbers = #tpu.dot_dimension_numbers<[1], [0], [0], [1], [0, 0, 1, 1], [], []>} : vector<8x8xf32>, vector<8x8xf32>, vector<8x8xf32> -> vector<8x8xf32>
    %c0_311 = arith.constant 0 : index
    %c0_312 = arith.constant 0 : index
    %281 = vector.load %arg12[%c0_311, %c0_312] : memref<8x32xf32, #tpu.memory_space<vmem>>, vector<8x8xf32>
    tpu.vector_store %arg12[%c0_311, %c0_312], %280 {strides = array<i32>} : memref<8x32xf32, #tpu.memory_space<vmem>>, vector<8x8xf32>,
    %c0_313 = arith.constant 0 : index
    %c8_314 = arith.constant 8 : index
    %c0_315 = arith.constant 0 : index
    %282 = vector.load %arg11[%c0_313, %c8_314, %c0_315] : memref<3x32x8xf32, #tpu.memory_space<vmem>>, vector<1x8x8xf32>
    %283 = vector.shape_cast %282 : vector<1x8x8xf32> to vector<8x8xf32>
    %cst_316 = arith.constant 0.353553385 : f32
    %284 = vector.broadcast %cst_316 : f32 to vector<8x8xf32>
    %285 = arith.mulf %283, %284 : vector<8x8xf32>
    %c1_317 = arith.constant 1 : index
    %c8_318 = arith.constant 8 : index
    %c0_319 = arith.constant 0 : index
    %286 = vector.load %arg11[%c1_317, %c8_318, %c0_319] : memref<3x32x8xf32, #tpu.memory_space<vmem>>, vector<1x8x8xf32>
    %287 = vector.shape_cast %286 : vector<1x8x8xf32> to vector<8x8xf32>
    %c2_320 = arith.constant 2 : index
    %c8_321 = arith.constant 8 : index
    %c0_322 = arith.constant 0 : index
    %288 = vector.load %arg11[%c2_320, %c8_321, %c0_322] : memref<3x32x8xf32, #tpu.memory_space<vmem>>, vector<1x8x8xf32>
    %289 = vector.shape_cast %288 : vector<1x8x8xf32> to vector<8x8xf32>
    %cst_323 = arith.constant dense<0.000000e+00> : vector<8x8xf32>
    %290 = tpu.matmul %285, %287, %cst_323 {dimension_numbers = #tpu.dot_dimension_numbers<[1], [1], [0], [0], [0, 0, 1, 0], [], []>} : vector<8x8xf32>, vector<8x8xf32>, vector<8x8xf32> -> vector<8x8xf32>
    %cst_324 = arith.constant dense<0xFF800000> : vector<8xf32>
    %291 = vector.multi_reduction <maximumf>, %290, %cst_324 [1] : vector<8x8xf32> to vector<8xf32>
    %292 = vector.shape_cast %291 : vector<8xf32> to vector<8x1xf32>
    %293 = vector.broadcast %292 : vector<8x1xf32> to vector<8x8xf32>
    %294 = arith.subf %290, %293 : vector<8x8xf32>
    %295 = math.exp %294 : vector<8x8xf32>
    %cst_325 = arith.constant dense<0.000000e+00> : vector<8xf32>
    %296 = vector.multi_reduction <add>, %295, %cst_325 [1] : vector<8x8xf32> to vector<8xf32>
    %297 = vector.shape_cast %296 : vector<8xf32> to vector<8x1xf32>
    %298 = tpu.reciprocal %297 {approx = true} : vector<8x1xf32> -> vector<8x1xf32>
    %299 = vector.broadcast %298 : vector<8x1xf32> to vector<8x8xf32>
    %300 = arith.mulf %295, %299 : vector<8x8xf32>
    %cst_326 = arith.constant dense<0.000000e+00> : vector<8x8xf32>
    %301 = tpu.matmul %300, %289, %cst_326 {dimension_numbers = #tpu.dot_dimension_numbers<[1], [0], [0], [1], [0, 0, 1, 1], [], []>} : vector<8x8xf32>, vector<8x8xf32>, vector<8x8xf32> -> vector<8x8xf32>
    %c0_327 = arith.constant 0 : index
    %c8_328 = arith.constant 8 : index
    %302 = vector.load %arg12[%c0_327, %c8_328] : memref<8x32xf32, #tpu.memory_space<vmem>>, vector<8x8xf32>
    tpu.vector_store %arg12[%c0_327, %c8_328], %301 {strides = array<i32>} : memref<8x32xf32, #tpu.memory_space<vmem>>, vector<8x8xf32>,
    %c0_329 = arith.constant 0 : index
    %c16_330 = arith.constant 16 : index
    %c0_331 = arith.constant 0 : index
    %303 = vector.load %arg11[%c0_329, %c16_330, %c0_331] : memref<3x32x8xf32, #tpu.memory_space<vmem>>, vector<1x8x8xf32>
    %304 = vector.shape_cast %303 : vector<1x8x8xf32> to vector<8x8xf32>
    %cst_332 = arith.constant 0.353553385 : f32
    %305 = vector.broadcast %cst_332 : f32 to vector<8x8xf32>
    %306 = arith.mulf %304, %305 : vector<8x8xf32>
    %c1_333 = arith.constant 1 : index
    %c16_334 = arith.constant 16 : index
    %c0_335 = arith.constant 0 : index
    %307 = vector.load %arg11[%c1_333, %c16_334, %c0_335] : memref<3x32x8xf32, #tpu.memory_space<vmem>>, vector<1x8x8xf32>
    %308 = vector.shape_cast %307 : vector<1x8x8xf32> to vector<8x8xf32>
    %c2_336 = arith.constant 2 : index
    %c16_337 = arith.constant 16 : index
    %c0_338 = arith.constant 0 : index
    %309 = vector.load %arg11[%c2_336, %c16_337, %c0_338] : memref<3x32x8xf32, #tpu.memory_space<vmem>>, vector<1x8x8xf32>
    %310 = vector.shape_cast %309 : vector<1x8x8xf32> to vector<8x8xf32>
    %cst_339 = arith.constant dense<0.000000e+00> : vector<8x8xf32>
    %311 = tpu.matmul %306, %308, %cst_339 {dimension_numbers = #tpu.dot_dimension_numbers<[1], [1], [0], [0], [0, 0, 1, 0], [], []>} : vector<8x8xf32>, vector<8x8xf32>, vector<8x8xf32> -> vector<8x8xf32>
    %cst_340 = arith.constant dense<0xFF800000> : vector<8xf32>
    %312 = vector.multi_reduction <maximumf>, %311, %cst_340 [1] : vector<8x8xf32> to vector<8xf32>
    %313 = vector.shape_cast %312 : vector<8xf32> to vector<8x1xf32>
    %314 = vector.broadcast %313 : vector<8x1xf32> to vector<8x8xf32>
    %315 = arith.subf %311, %314 : vector<8x8xf32>
    %316 = math.exp %315 : vector<8x8xf32>
    %cst_341 = arith.constant dense<0.000000e+00> : vector<8xf32>
    %317 = vector.multi_reduction <add>, %316, %cst_341 [1] : vector<8x8xf32> to vector<8xf32>
    %318 = vector.shape_cast %317 : vector<8xf32> to vector<8x1xf32>
    %319 = tpu.reciprocal %318 {approx = true} : vector<8x1xf32> -> vector<8x1xf32>
    %320 = vector.broadcast %319 : vector<8x1xf32> to vector<8x8xf32>
    %321 = arith.mulf %316, %320 : vector<8x8xf32>
    %cst_342 = arith.constant dense<0.000000e+00> : vector<8x8xf32>
    %322 = tpu.matmul %321, %310, %cst_342 {dimension_numbers = #tpu.dot_dimension_numbers<[1], [0], [0], [1], [0, 0, 1, 1], [], []>} : vector<8x8xf32>, vector<8x8xf32>, vector<8x8xf32> -> vector<8x8xf32>
    %c0_343 = arith.constant 0 : index
    %c16_344 = arith.constant 16 : index
    %323 = vector.load %arg12[%c0_343, %c16_344] : memref<8x32xf32, #tpu.memory_space<vmem>>, vector<8x8xf32>
    tpu.vector_store %arg12[%c0_343, %c16_344], %322 {strides = array<i32>} : memref<8x32xf32, #tpu.memory_space<vmem>>, vector<8x8xf32>,
    %c0_345 = arith.constant 0 : index
    %c24_346 = arith.constant 24 : index
    %c0_347 = arith.constant 0 : index
    %324 = vector.load %arg11[%c0_345, %c24_346, %c0_347] : memref<3x32x8xf32, #tpu.memory_space<vmem>>, vector<1x8x8xf32>
    %325 = vector.shape_cast %324 : vector<1x8x8xf32> to vector<8x8xf32>
    %cst_348 = arith.constant 0.353553385 : f32
    %326 = vector.broadcast %cst_348 : f32 to vector<8x8xf32>
    %327 = arith.mulf %325, %326 : vector<8x8xf32>
    %c1_349 = arith.constant 1 : index
    %c24_350 = arith.constant 24 : index
    %c0_351 = arith.constant 0 : index
    %328 = vector.load %arg11[%c1_349, %c24_350, %c0_351] : memref<3x32x8xf32, #tpu.memory_space<vmem>>, vector<1x8x8xf32>
    %329 = vector.shape_cast %328 : vector<1x8x8xf32> to vector<8x8xf32>
    %c2_352 = arith.constant 2 : index
    %c24_353 = arith.constant 24 : index
    %c0_354 = arith.constant 0 : index
    %330 = vector.load %arg11[%c2_352, %c24_353, %c0_354] : memref<3x32x8xf32, #tpu.memory_space<vmem>>, vector<1x8x8xf32>
    %331 = vector.shape_cast %330 : vector<1x8x8xf32> to vector<8x8xf32>
    %cst_355 = arith.constant dense<0.000000e+00> : vector<8x8xf32>
    %332 = tpu.matmul %327, %329, %cst_355 {dimension_numbers = #tpu.dot_dimension_numbers<[1], [1], [0], [0], [0, 0, 1, 0], [], []>} : vector<8x8xf32>, vector<8x8xf32>, vector<8x8xf32> -> vector<8x8xf32>
    %cst_356 = arith.constant dense<0xFF800000> : vector<8xf32>
    %333 = vector.multi_reduction <maximumf>, %332, %cst_356 [1] : vector<8x8xf32> to vector<8xf32>
    %334 = vector.shape_cast %333 : vector<8xf32> to vector<8x1xf32>
    %335 = vector.broadcast %334 : vector<8x1xf32> to vector<8x8xf32>
    %336 = arith.subf %332, %335 : vector<8x8xf32>
    %337 = math.exp %336 : vector<8x8xf32>
    %cst_357 = arith.constant dense<0.000000e+00> : vector<8xf32>
    %338 = vector.multi_reduction <add>, %337, %cst_357 [1] : vector<8x8xf32> to vector<8xf32>
    %339 = vector.shape_cast %338 : vector<8xf32> to vector<8x1xf32>
    %340 = tpu.reciprocal %339 {approx = true} : vector<8x1xf32> -> vector<8x1xf32>
    %341 = vector.broadcast %340 : vector<8x1xf32> to vector<8x8xf32>
    %342 = arith.mulf %337, %341 : vector<8x8xf32>
    %cst_358 = arith.constant dense<0.000000e+00> : vector<8x8xf32>
    %343 = tpu.matmul %342, %331, %cst_358 {dimension_numbers = #tpu.dot_dimension_numbers<[1], [0], [0], [1], [0, 0, 1, 1], [], []>} : vector<8x8xf32>, vector<8x8xf32>, vector<8x8xf32> -> vector<8x8xf32>
    %c0_359 = arith.constant 0 : index
    %c24_360 = arith.constant 24 : index
    %344 = vector.load %arg12[%c0_359, %c24_360] : memref<8x32xf32, #tpu.memory_space<vmem>>, vector<8x8xf32>
    tpu.vector_store %arg12[%c0_359, %c24_360], %343 {strides = array<i32>} : memref<8x32xf32, #tpu.memory_space<vmem>>, vector<8x8xf32>,
    %c0_361 = arith.constant 0 : index
    %c0_362 = arith.constant 0 : index
    %345 = vector.load %arg8[%c0_361, %c0_362] : memref<8x8xf32, #tpu.memory_space<vmem>>, vector<8x8xf32>
    %c0_363 = arith.constant 0 : index
    %c0_364 = arith.constant 0 : index
    %346 = vector.load %arg12[%c0_363, %c0_364] : memref<8x32xf32, #tpu.memory_space<vmem>>, vector<8x32xf32>
    %cst_365 = arith.constant dense<0.000000e+00> : vector<8x32xf32>
    %347 = tpu.matmul %345, %346, %cst_365 {dimension_numbers = #tpu.dot_dimension_numbers<[1], [0], [0], [1], [0, 0, 1, 1], [], []>} : vector<8x8xf32>, vector<8x32xf32>, vector<8x32xf32> -> vector<8x32xf32>
    %c0_366 = arith.constant 0 : index
    %c0_367 = arith.constant 0 : index
    %348 = vector.load %arg7[%c0_366, %c0_367] : memref<32x32xf32, #tpu.memory_space<vmem>>, vector<32x32xf32>
    %cst_368 = arith.constant dense<0.000000e+00> : vector<8x32xf32>
    %349 = tpu.matmul %347, %348, %cst_368 {dimension_numbers = #tpu.dot_dimension_numbers<[1], [0], [0], [1], [0, 0, 1, 1], [], []>} : vector<8x32xf32>, vector<32x32xf32>, vector<8x32xf32> -> vector<8x32xf32>
    %c0_369 = arith.constant 0 : index
    %c0_370 = arith.constant 0 : index
    %350 = vector.load %arg9[%c0_369, %c0_370] : memref<8x32xf32, #tpu.memory_space<vmem>>, vector<8x32xf32>
    tpu.vector_store %arg9[%c0_369, %c0_370], %349 {strides = array<i32>} : memref<8x32xf32, #tpu.memory_space<vmem>>, vector<8x32xf32>,
    return
  }
  func.func @transform_0(%arg0: i32) -> (i32, i32, i32) {
    %c0_i32 = arith.constant 0 : i32
    %c0_i32_0 = arith.constant 0 : i32
    %c0_i32_1 = arith.constant 0 : i32
    return %arg0, %c0_i32, %c0_i32_0 : i32, i32, i32
  }
  func.func @transform_1(%arg0: i32) -> (i32, i32, i32) {
    %c0_i32 = arith.constant 0 : i32
    %c0_i32_0 = arith.constant 0 : i32
    %c0_i32_1 = arith.constant 0 : i32
    return %arg0, %c0_i32, %c0_i32_0 : i32, i32, i32
  }
  func.func @transform_2(%arg0: i32) -> (i32, i32, i32) {
    %c0_i32 = arith.constant 0 : i32
    %c0_i32_0 = arith.constant 0 : i32
    %c0_i32_1 = arith.constant 0 : i32
    return %arg0, %c0_i32, %c0_i32_0 : i32, i32, i32
  }
  func.func @transform_3(%arg0: i32) -> (i32, i32) {
    %c0_i32 = arith.constant 0 : i32
    %c0_i32_0 = arith.constant 0 : i32
    %c0_i32_1 = arith.constant 0 : i32
    return %c0_i32, %c0_i32_0 : i32, i32
  }
  func.func @transform_4(%arg0: i32) -> (i32, i32) {
    %c0_i32 = arith.constant 0 : i32
    %c0_i32_0 = arith.constant 0 : i32
    %c0_i32_1 = arith.constant 0 : i32
    return %c0_i32, %c0_i32_0 : i32, i32
  }
  func.func @transform_5(%arg0: i32) -> (i32, i32) {
    %c0_i32 = arith.constant 0 : i32
    %c0_i32_0 = arith.constant 0 : i32
    %c0_i32_1 = arith.constant 0 : i32
    return %c0_i32, %c0_i32_0 : i32, i32
  }
  func.func @transform_6(%arg0: i32) -> (i32, i32) {
    %c0_i32 = arith.constant 0 : i32
    %c0_i32_0 = arith.constant 0 : i32
    %c0_i32_1 = arith.constant 0 : i32
    return %c0_i32, %c0_i32_0 : i32, i32
  }
  func.func @transform_7(%arg0: i32) -> (i32, i32) {
    %c0_i32 = arith.constant 0 : i32
    %c0_i32_0 = arith.constant 0 : i32
    %c0_i32_1 = arith.constant 0 : i32
    return %c0_i32, %c0_i32_0 : i32, i32
  }
  func.func @transform_8(%arg0: i32) -> (i32, i32) {
    %c0_i32 = arith.constant 0 : i32
    %c0_i32_0 = arith.constant 0 : i32
    return %arg0, %c0_i32 : i32, i32
  }
}

</mosaic_0001>

<bundles_post_ra>
// kernel: tpu_custom_call.1
= control target key start
LH: loop header
LB: loop body
LE: loop exit
PB: predicated region body
PF: predicated region fallthrough
CT: control target
= control target key end

     0   :  { %s3115_s0 = inlined_call_operand.hbm [shape: f32[2,8,32], index: 0, kind: input, shape index: {}]   ;;  %s3116_s1 = inlined_call_operand.hbm [shape: f32[2,8,32], index: 1, kind: input, shape index: {}]   ;;  %s3117_s2 = inlined_call_operand.hbm [shape: f32[2,8,32], index: 2, kind: input, shape index: {}]   ;;  %s3118_s3 = inlined_call_operand.hbm [shape: f32[32,32], index: 3, kind: input, shape index: {}]   ;;  %s3119_s4 = inlined_call_operand.hbm [shape: f32[32,32], index: 4, kind: input, shape index: {}]   ;;  %s3120_s5 = inlined_call_operand.hbm [shape: f32[32,32], index: 5, kind: input, shape index: {}]   ;;  %s3121_s6 = inlined_call_operand.hbm [shape: f32[32,32], index: 6, kind: input, shape index: {}]   ;;  %s3122_s7 = inlined_call_operand.vmem [shape: f32[8,8], index: 7, kind: input, shape index: {}]   ;;  %s3123_s8 = inlined_call_operand.hbm [shape: f32[16,32], index: 8, kind: output, shape index: {}]  }
   0x1   :  { %3149 = sst [smem:[#allocation29_spill]] %s3116_s1 }
   0x2   :  { %3150 = sst [smem:[#allocation30_spill]] %s3118_s3 }
   0x3   :  { %3151 = sst [smem:[#allocation31_spill]] %s3120_s5 }
   0x4   :  { %3152 = sst [smem:[#allocation32_spill]] %s3123_s8 }
   0x5   :  { %13 = vsyncpa [#allocation6], 0 }
   0x6   :  { %15 = vsyncpa [#allocation6 + $0x1], 0 }
   0x7   :  { %16 = vsyncpa [#allocation9], 0 }
   0x8   :  { %18 = vsyncpa [#allocation9 + $0x1], 0 }
   0x9   :  { %19 = vsyncpa [#allocation12], 0 }
   0xa   :  { %20 = vsyncpa [#allocation15], 0 }
   0xb   :  { %21 = vsyncpa [#allocation7], 0 }
   0xc   :  { %23 = vsyncpa [#allocation7 + $0x1], 0  ;;  %s2591_s27 = smov 0   ;;  %s2593_s28 = smov 0  }
   0xd   :  { %s2595_s29 = smov 0   ;;  %s2597_s30 = smov 0  }
   0xe LB: > { %3153 = sst [smem:[#allocation23_spill]] %s2513_s27  ;;  %s2527_s9 = smov [#allocation11]   ;;  %s2525_s30 = sphi %s2597_s30, %s3192_s30   ;;  %s2521_s29 = sphi %s2595_s29, %s3196_s29   ;;  %s2517_s28 = sphi %s2593_s28, %s3195_s28   ;;  %s2513_s27 = sphi %s2591_s27, %s3194_s27  }
   0xf   : > { %3154 = sst [smem:[#allocation24_spill]] %s2525_s30  ;;  %s255_s10 = sshll.u32 %s2527_s9, 4  ;;  %s2617_s10 = int_to_ptr.vmem [resolvable:$true] %s255_s10 }
  0x10   : > { %s2612_s11 = sadd.s32 4294967295, %s2525_s30   ;;  %p1928_p0 = scmp.ge.s32.totalorder %s2525_s30, 1 }
  0x11   : > { %p3134_p1 = scmp.eq.s32.totalorder %s2612_s11, 0  ;;  %p243_p2 = scmp.lt.s32.totalorder %s2525_s30, 3 }
  0x12   : > { %s2528_s13 = smov [#allocation14]   ;;  %s3157_s3 = sld [smem:[#allocation30_spill]] }
  0x13   : > { %p2619_p3 = pnand %p1928_p0, %p243_p2  ;;  %s281_s14 = sshll.u32 %s2528_s13, 4  ;;  %s2632_s14 = int_to_ptr.vmem [resolvable:$true] %s281_s14 }
  0x15   : > { %s3155_s12 = scalar_select %p2619_p3, 1, 0 }
  0x16   : > { %p2145_p5 = pneg %p2619_p3 }
  0x18   : > { %p2628_p6 = pnand %p2145_p5, %p3134_p1  ;;  %s2245_s18 = scalar_lea.hbm %s3157_s3, 512 }
  0x19   : > { %p2246_p7 = scmp.ne.s32.totalorder %s3157_s3, %s2245_s18  ;;  %p2252_p11 = scmp.lt.u32.totalorder %s2245_s18, %s3157_s3 }
  0x1a   : > { %s3156_s15 = scalar_select %p2628_p6, 1, 0 }
  0x1b   : > { %p2642_p8 = pneg %p2628_p6 }
  0x1d   : > { %s3158_s21 = scalar_select %p2642_p8, 1, 0 }
  0x1e   : > { %p2248_p9 = pnand %p2642_p8, %p2246_p7 }
  0x20   : > { %p2249_p10 = pneg %p2248_p9 }
  0x22   : > { %p2254_p12 = pnand %p2252_p11, %p2249_p10 }
  0x24   : > { %2257 = shalt.err (!%p2254_p12)
}
  0x25   : > { %s2258_s24 = scalar_lea.vmem %s2617_s10, 512  ;;  %p2266_p5 = scmp.lt.s32.totalorder %s2617_s10, %s2617_s10 }
  0x26   : > { %p2259_p13 = scmp.ne.s32.totalorder %s2617_s10, %s2258_s24  ;;  %p2267_p4 = scmp.lt.s32.totalorder %s2258_s24, %s2258_s24 }
  0x28   : > { %p2261_p0 = pnand %p2259_p13, %p2642_p8  ;;  %p2268_p7 = por %p2267_p4, %p2266_p5 }
  0x2a   : > { %p2262_p2 = pneg %p2261_p0 }
  0x2c   : > { %p2269_p9 = pnand %p2268_p7, %p2262_p2 }
  0x2e   : > { %2272 = shalt.err (!%p2269_p9)
}
  0x2f   : > { %s3125_s25 = smov 128   ;;  %s3128_s26 = smov 8  }
  0x30   : > { %2148 = dma.hbm_to_vmem [thread:$0]  (!%p2628_p6), %s3157_s3, 512, %s2617_s10, [#allocation12], %s3125_s25, %s3125_s25, %s3128_s26  }
  0x31   : > { %s3159_s5 = sld [smem:[#allocation31_spill]] }
  0x37   : > { %s2273_s18 = scalar_lea.hbm %s3159_s5, 512 }
  0x38   : > { %p2274_p4 = scmp.ne.s32.totalorder %s3159_s5, %s2273_s18  ;;  %p2280_p12 = scmp.lt.u32.totalorder %s2273_s18, %s3159_s5 }
  0x3a   : > { %p2276_p10 = pnand %p2274_p4, %p2642_p8 }
  0x3c   : > { %p2277_p11 = pneg %p2276_p10 }
  0x3e   : > { %p2282_p13 = pnand %p2280_p12, %p2277_p11 }
  0x40   : > { %2285 = shalt.err (!%p2282_p13)
}
  0x41   : > { %s2286_s10 = scalar_lea.vmem %s2632_s14, 512  ;;  %p2294_p7 = scmp.lt.s32.totalorder %s2632_s14, %s2632_s14 }
  0x42   : > { %p2287_p0 = scmp.ne.s32.totalorder %s2632_s14, %s2286_s10  ;;  %p2295_p9 = scmp.lt.s32.totalorder %s2286_s10, %s2286_s10 }
  0x44   : > { %p2289_p2 = pnand %p2287_p0, %p2642_p8  ;;  %p2296_p4 = por %p2295_p9, %p2294_p7 }
  0x46   : > { %p2290_p5 = pneg %p2289_p2 }
  0x48   : > { %p2297_p10 = pnand %p2296_p4, %p2290_p5 }
  0x4a   : > { %2300 = shalt.err (!%p2297_p10)
}
  0x4b   : > { %2154 = dma.hbm_to_vmem [thread:$0]  (!%p2628_p6), %s3159_s5, 512, %s2632_s14, [#allocation15], %s3125_s25, %s3125_s25, %s3128_s26  }
  0x4c   : > { %s1927_s13 = sadd.s32 4294967294, %s2525_s30   ;;  %s2694_s16 = sadd.s32 1, %s2525_s30  }
  0x4d   : > { %3160 = sst [smem:[#allocation25_spill]] %s2694_s16  ;;  %s33_s17 = ssub.s32 %s2525_s30, %s2694_s16 }
  0x4e   : > { %s36_s18 = sadd.s32 1, %s2521_s29  ;;  %p34_p11 = scmp.eq.s32.totalorder %s33_s17, 0 }
  0x4f   : > { %p43_p12 = scmp.ne.s32.totalorder %s2521_s29, %s2517_s28  ;;  %p44_p13 = scmp.eq.s32.totalorder %s2525_s30, 0 }
  0x50   : > { %p49_p0 = scmp.ne.s32.totalorder %s2517_s28, %s2513_s27  ;;  %p230_p7 = scmp.eq.s32.totalorder %s2612_s11, 1 }
  0x51   : > { %s2705_s19 = scalar_select %p34_p11, %s2521_s29, %s36_s18  }
  0x52   : > { %p45_p2 = por %p44_p13, %p43_p12  ;;  %p2709_p5 = por %p3134_p1, %p49_p0 }
  0x53   : > { %3161 = sst [smem:[#allocation26_spill]] %s2705_s19  ;;  %p236_p9 = scmp.eq.s32.totalorder %s1927_s13, 1 }
  0x54   : > { %s3162_s20 = scalar_select %p2709_p5, 1, 0 }
  0x55   : > { %p2176_p4 = scmp.lt.s32.totalorder %s2525_s30, 2  ;;  %s3127_s14 = sand.u32 1, %s2521_s29  }
  0x56   : > { %p2716_p10 = por %p230_p7, %p43_p12  ;;  %p2720_p3 = por %p236_p9, %p49_p0 }
  0x57   : > { %s2726_s10 = sshll.u32 %s3127_s14, 3  ;;  %s2729_s24 = sshll.u32 %s2525_s30, 7 }
  0x58   : > { %s3163_s22 = scalar_select %p2716_p10, 1, 0 }
  0x59   : > { %s3165_s23 = scalar_select %p2720_p3, 1, 0 }
  0x5a   : > { %3164 = sst [smem:[#allocation27_spill]] %s3163_s22  ;;  %p2731_p11 = pnand %p2176_p4, %p45_p2 }
  0x5b   : > { %3166 = sst [smem:[#allocation28_spill]] %s3165_s23  ;;  %s329_s13 = sand.u32 1, %s2525_s30  }
  0x5c   : > { %s3167_s9 = scalar_select %p2731_p11, 1, 0 }
  0x5d   : > { %s3168_s1 = sld [smem:[#allocation29_spill]]  ;;  %s333_s14 = scalar_lea.vmem [#allocation8], %s2726_s10 }
  0x5e   : > { %s340_s26 = sshll.u32 %s333_s14, 4  ;;  %s2531_s3 = smov [#allocation13]   ;;  %s2743_s26 = int_to_ptr.vmem [resolvable:$true] %s340_s26 }
  0x5f   : > { %s2745_s5 = sshll.u32 %s2531_s3, 4  ;;  %s2747_s19 = scalar_lea.sflag [#allocation9], %s329_s13  ;;  %s269_s5 = int_to_ptr.vmem [resolvable:$true] %s2745_s5 }
  0x60   : > { %p2753_p13 = pneg %p2731_p11 }
  0x62   : > { %s3169_s17 = scalar_select %p2753_p13, 1, 0 }
  0x63   : > { %s2740_s25 = scalar_lea.hbm %s3168_s1, %s2729_s24  ;;  %s2306_s30 = scalar_lea.hbm %s3168_s1, 256 }
  0x64   : > { %s2301_s16 = scalar_lea.hbm %s2740_s25, 128  ;;  %p2307_p7 = scmp.lt.u32.totalorder %s2740_s25, %s3168_s1 }
  0x65   : > { %p2302_p12 = scmp.ne.s32.totalorder %s2740_s25, %s2301_s16  ;;  %p2308_p9 = scmp.lt.u32.totalorder %s2306_s30, %s2301_s16 }
  0x66   : > { %p2310_p1 = scmp.lt.u32.totalorder %s2301_s16, %s2740_s25 }
  0x67   : > { %p2304_p0 = pnand %p2753_p13, %p2302_p12  ;;  %p2309_p4 = por %p2308_p9, %p2307_p7 }
  0x69   : > { %p2305_p2 = pneg %p2304_p0  ;;  %p2311_p3 = por %p2310_p1, %p2309_p4 }
  0x6b   : > { %p2312_p10 = pnand %p2311_p3, %p2305_p2 }
  0x6d   : > { %2315 = shalt.err (!%p2312_p10)
}
  0x6e   : > { %s2316_s13 = scalar_lea.vmem %s2743_s26, 128  ;;  %s2532_s18 = smov [#allocation8]  }
  0x6f   : > { %p2317_p12 = scmp.ne.s32.totalorder %s2743_s26, %s2316_s13  ;;  %s2321_s14 = sshll.u32 %s2532_s18, 4  ;;  %s2322_s14 = int_to_ptr.vmem [resolvable:$false] %s2321_s14 }
  0x70   : > { %s2323_s23 = scalar_lea.vmem %s2322_s14, 256  ;;  %p2324_p6 = scmp.lt.s32.totalorder %s2743_s26, %s2322_s14 }
  0x71   : > { %p2319_p0 = pnand %p2317_p12, %p2753_p13  ;;  %p2325_p8 = scmp.lt.s32.totalorder %s2323_s23, %s2316_s13 }
  0x73   : > { %p2320_p5 = pneg %p2319_p0  ;;  %p2326_p7 = por %p2325_p8, %p2324_p6 }
  0x75   : > { %p2327_p9 = pnand %p2326_p7, %p2320_p5 }
  0x77   : > { %2330 = shalt.err (!%p2327_p9)
}
  0x78   : > { %2164 = dma.hbm_to_vmem [thread:$0]  (!%p2731_p11), %s2740_s25, 128, %s2743_s26, %s2747_s19  }
  0x79   : > { %s2331_s3 = scalar_lea.hbm %s3119_s4, 512  ;;  %p3170_p3 = scmp.ne.s32.totalorder %s3158_s21, 0 }
  0x7a   : > { %p2332_p1 = scmp.ne.s32.totalorder %s3119_s4, %s2331_s3  ;;  %p2338_p5 = scmp.lt.u32.totalorder %s2331_s3, %s3119_s4 }
  0x7c   : > { %p2334_p6 = pnand %p2332_p1, %p3170_p3 }
  0x7e   : > { %p2335_p8 = pneg %p2334_p6 }
  0x80   : > { %p2340_p10 = pnand %p2338_p5, %p2335_p8 }
  0x82   : > { %2343 = shalt.err (!%p2340_p10)
}
  0x83   : > { %s2344_s23 = scalar_lea.vmem %s269_s5, 512  ;;  %p2352_p0 = scmp.lt.s32.totalorder %s269_s5, %s269_s5 }
  0x84   : > { %p2345_p2 = scmp.ne.s32.totalorder %s269_s5, %s2344_s23  ;;  %p2353_p7 = scmp.lt.s32.totalorder %s2344_s23, %s2344_s23 }
  0x86   : > { %p2347_p4 = pnand %p2345_p2, %p3170_p3  ;;  %p2354_p9 = por %p2353_p7, %p2352_p0 }
  0x88   : > { %p2348_p12 = pneg %p2347_p4 }
  0x8a   : > { %p2355_p11 = pnand %p2354_p9, %p2348_p12 }
  0x8c   : > { %2358 = shalt.err (!%p2355_p11)
}
  0x8d   : > { %p3171_p1 = scmp.ne.s32.totalorder %s3156_s15, 0  ;;  %s3172_s1 = smov 8  }
  0x8e   : > { %s3173_s25 = smov 128   ;;  %s2533_s16 = smov [#allocation16]  }
  0x8f   : > { %2151 = dma.hbm_to_vmem [thread:$0]  (!%p3171_p1), %s3119_s4, 512, %s269_s5, [#allocation12], %s3173_s25, %s3173_s25, %s3172_s1  }
  0x90   : > { %s294_s3 = sshll.u32 %s2533_s16, 4  ;;  %s2359_s14 = scalar_lea.hbm %s3121_s6, 512  ;;  %s295_s3 = int_to_ptr.vmem [resolvable:$true] %s294_s3 }
  0x91   : > { %p2360_p11 = scmp.ne.s32.totalorder %s3121_s6, %s2359_s14  ;;  %p2366_p5 = scmp.lt.u32.totalorder %s2359_s14, %s3121_s6 }
  0x93   : > { %p2362_p6 = pnand %p2360_p11, %p3170_p3 }
  0x95   : > { %p2363_p8 = pneg %p2362_p6 }
  0x97   : > { %p2368_p10 = pnand %p2366_p5, %p2363_p8 }
  0x99   : > { %2371 = shalt.err (!%p2368_p10)
}
  0x9a   : > { %s2372_s5 = scalar_lea.vmem %s295_s3, 512  ;;  %p2380_p0 = scmp.lt.s32.totalorder %s295_s3, %s295_s3 }
  0x9b   : > { %p2373_p2 = scmp.ne.s32.totalorder %s295_s3, %s2372_s5  ;;  %p2381_p7 = scmp.lt.s32.totalorder %s2372_s5, %s2372_s5 }
  0x9d   : > { %p2375_p4 = pnand %p2373_p2, %p3170_p3  ;;  %p2382_p9 = por %p2381_p7, %p2380_p0 }
  0x9f   : > { %p2376_p12 = pneg %p2375_p4 }
  0xa1   : > { %p2383_p13 = pnand %p2382_p9, %p2376_p12 }
  0xa3   : > { %2386 = shalt.err (!%p2383_p13)
}
  0xa4   : > { %2157 = dma.hbm_to_vmem [thread:$0]  (!%p3171_p1), %s3121_s6, 512, %s295_s3, [#allocation15], %s3173_s25, %s3173_s25, %s3172_s1  }
  0xa5   : > { %s2824_s26 = scalar_lea.hbm %s3115_s0, %s2729_s24  ;;  %s315_s15 = scalar_lea.vmem [#allocation5], %s2726_s10 }
  0xa6   : > { %s322_s30 = sshll.u32 %s315_s15, 4  ;;  %s3174_s16 = sand.u32 1, %s2521_s29   ;;  %s323_s30 = int_to_ptr.vmem [resolvable:$true] %s322_s30 }
  0xa7   : > { %s312_s18 = scalar_lea.sflag [#allocation6], %s3174_s16  ;;  %s2387_s13 = scalar_lea.hbm %s2824_s26, 128 }
  0xa8   : > { %p2388_p13 = scmp.ne.s32.totalorder %s2824_s26, %s2387_s13  ;;  %p3175_p3 = scmp.ne.s32.totalorder %s3169_s17, 0 }
  0xa9   : > { %s2392_s3 = scalar_lea.hbm %s3115_s0, 256  ;;  %p2393_p1 = scmp.lt.u32.totalorder %s2824_s26, %s3115_s0 }
  0xaa   : > { %p2390_p11 = pnand %p2388_p13, %p3175_p3  ;;  %p2394_p8 = scmp.lt.u32.totalorder %s2392_s3, %s2387_s13 }
  0xab   : > { %p2396_p10 = scmp.lt.u32.totalorder %s2387_s13, %s2824_s26 }
  0xac   : > { %p2391_p6 = pneg %p2390_p11  ;;  %p2395_p5 = por %p2394_p8, %p2393_p1 }
  0xae   : > { %p2397_p2 = por %p2396_p10, %p2395_p5 }
  0xb0   : > { %p2398_p4 = pnand %p2397_p2, %p2391_p6 }
  0xb2   : > { %2401 = shalt.err (!%p2398_p4)
}
  0xb3   : > { %s2402_s5 = scalar_lea.vmem %s323_s30, 128  ;;  %s2534_s8 = smov [#allocation5]  }
  0xb4   : > { %p2403_p12 = scmp.ne.s32.totalorder %s323_s30, %s2402_s5  ;;  %s2407_s27 = sshll.u32 %s2534_s8, 4  ;;  %s2408_s27 = int_to_ptr.vmem [resolvable:$false] %s2407_s27 }
  0xb5   : > { %s2409_s21 = scalar_lea.vmem %s2408_s27, 256  ;;  %p2410_p9 = scmp.lt.s32.totalorder %s323_s30, %s2408_s27 }
  0xb6   : > { %p2405_p0 = pnand %p2403_p12, %p3175_p3  ;;  %p2411_p13 = scmp.lt.s32.totalorder %s2409_s21, %s2402_s5 }
  0xb8   : > { %p2406_p7 = pneg %p2405_p0  ;;  %p2412_p11 = por %p2411_p13, %p2410_p9 }
  0xba   : > { %p2413_p1 = pnand %p2412_p11, %p2406_p7 }
  0xbc   : > { %2416 = shalt.err (!%p2413_p1)
}
  0xbd   : > { %p3176_p8 = scmp.ne.s32.totalorder %s3167_s9, 0  ;;  %s2850_s16 = scalar_lea.hbm %s3117_s2, %s2729_s24 }
  0xbe   : > { %s351_s13 = scalar_lea.vmem [#allocation10], %s2726_s10  ;;  %s2417_s25 = scalar_lea.hbm %s2850_s16, 128 }
  0xbf   : > { %2161 = dma.hbm_to_vmem [thread:$0]  (!%p3176_p8), %s2824_s26, 128, %s323_s30, %s312_s18  }
  0xc0   : > { %s358_s1 = sshll.u32 %s351_s13, 4  ;;  %p2418_p6 = scmp.ne.s32.totalorder %s2850_s16, %s2417_s25  ;;  %s359_s1 = int_to_ptr.vmem [resolvable:$true] %s358_s1 }
  0xc1   : > { %s2422_s26 = scalar_lea.hbm %s3117_s2, 256  ;;  %p2423_p2 = scmp.lt.u32.totalorder %s2850_s16, %s3117_s2 }
  0xc2   : > { %p2420_p5 = pnand %p2418_p6, %p3175_p3  ;;  %p2424_p4 = scmp.lt.u32.totalorder %s2422_s26, %s2417_s25 }
  0xc3   : > { %p2426_p0 = scmp.lt.u32.totalorder %s2417_s25, %s2850_s16 }
  0xc4   : > { %p2421_p10 = pneg %p2420_p5  ;;  %p2425_p12 = por %p2424_p4, %p2423_p2 }
  0xc6   : > { %p2427_p7 = por %p2426_p0, %p2425_p12 }
  0xc8   : > { %p2428_p9 = pnand %p2427_p7, %p2421_p10 }
  0xca   : > { %2431 = shalt.err (!%p2428_p9)
}
  0xcb   : > { %s2432_s10 = scalar_lea.vmem %s359_s1, 128  ;;  %s2535_s24 = smov [#allocation10]  }
  0xcc   : > { %p2433_p13 = scmp.ne.s32.totalorder %s359_s1, %s2432_s10  ;;  %s2437_s23 = sshll.u32 %s2535_s24, 4  ;;  %s2438_s23 = int_to_ptr.vmem [resolvable:$false] %s2437_s23 }
  0xcd   : > { %s2439_s5 = scalar_lea.vmem %s2438_s23, 256  ;;  %p2440_p6 = scmp.lt.s32.totalorder %s359_s1, %s2438_s23 }
  0xce   : > { %p2435_p11 = pnand %p2433_p13, %p3175_p3  ;;  %p2441_p5 = scmp.lt.s32.totalorder %s2439_s5, %s2432_s10 }
  0xd0   : > { %p2436_p1 = pneg %p2435_p11  ;;  %p2442_p8 = por %p2441_p5, %p2440_p6 }
  0xd2   : > { %p2443_p2 = pnand %p2442_p8, %p2436_p1 }
  0xd4   : > { %2446 = shalt.err (!%p2443_p2)
}
  0xd5   : > { %p3177_p4 = scmp.ne.s32.totalorder %s3167_s9, 0  ;;  %p3178_p10 = scmp.ne.s32.totalorder %s3155_s12, 0 }
  0xd6   : > { %s2874_s17 = sand.u32 (!%p3178_p10), 1, %s2517_s28   ;;  %p3179_p3 = scmp.ne.s32.totalorder (!%p3178_p10), %s3162_s20, 0 }
  0xd7   : > { %2167 = dma.hbm_to_vmem [thread:$0]  (!%p3177_p4), %s2850_s16, 128, %s359_s1, %s2747_s19  }
  0xd8   : > { %367 = sbr.rel (%p3178_p10) target bundleno = 1937 (0x791), region = 52  ;;  %s2877_s8 = sshll.u32 (!%p3178_p10), %s2874_s17, 3 }
  0xd9   : > { %s370_s27 = scalar_lea.sflag (!%p3178_p10), [#allocation6], %s2874_s17  ;;  %s373_s21 = scalar_lea.vmem (!%p3178_p10), [#allocation5], %s2877_s8 }
  0xdf   : > { %2492 = dma.done.wait (%p3179_p3), %s370_s27, 128  }
  0xe0   : > { %2494 = vsyncadd (%p3179_p3), %s370_s27, 4294967168  ;;  %s378_s12 = sand.u32 1, %s2612_s11   ;;  %s382_s9 = scalar_lea.vmem [#allocation8], %s2877_s8 }
  0xe1   : > { %s379_s19 = scalar_lea.sflag [#allocation9], %s378_s12 }
  0xe2   : > { %2496 = dma.done.wait (%p3179_p3), %s379_s19, 256  }
  0xe3   : > { %2498 = vsyncadd (%p3179_p3), %s379_s19, 4294967040  ;;  %s391_s22 = scalar_lea.vmem [#allocation10], %s2877_s8  ;;  %p3180_p8 = scmp.eq.s32.totalorder %s2612_s11, 0 }
  0xe5   : > { %2500 = dma.done.wait (%p3180_p8), [#allocation12], 1024   ;;  %p3181_p12 = pmov %p3180_p8 }
  0xe6   : > { %p3182_p0 = pmov %p3180_p8 }
  0xe7   : > { %2502 = vsyncadd (%p3181_p12), [#allocation12], 4294966272 }
  0xe8   : > { %2504 = dma.done.wait (%p3182_p0), [#allocation15], 1024   ;;  %p3183_p7 = pmov %p3182_p0 }
  0xe9   : > { %v2536_v0 = vmov 0.0|0.0   ;;  %vm2537_vm0 = vmmov 0   ;;  %v2538_v1 = vmov 0.0   ;;  %v531_v2 = vld [vmem:[#allocation13] sm:$0xff]  ;;  %v532_v3 = vld [vmem:[#allocation13 + $0x8] sm:$0xff]  ;;  %v533_v7 = vld [vmem:[#allocation13 + $0x10] sm:$0xff] }
  0xea   : > { %2506 = vsyncadd (%p3183_p7), [#allocation15], 4294966272  ;;  %2103 = vmatprep.subr.bf16.mxu1 %v2536_v0  ;;  %2097 = vmatprep.subr.bf16.mxu0 %v2536_v0  ;;  %v451_v4 = vld [vmem:[#allocation11] sm:$0xff]  ;;  %v2104_v5 = vpack.c.bf16 %v532_v3, %v531_v2  ;;  %v452_v6 = vld [vmem:[#allocation11 + $0x8] sm:$0xff]  ;;  %vm455_vm1 = vcmask 261120   ;;  %vm691_vm2 = vcmask 58368  }
  0xeb   : > { %2027 = vmatprep.mubr.msk.f32.mxu1 %vm2537_vm0, %v2538_v1  ;;  %2016 = vmatprep.mubr.msk.f32.mxu0 %vm2537_vm0, %v2538_v1  ;;  %v534_v8 = vld [vmem:[#allocation13 + $0x18] sm:$0xff]  ;;  %v2098_v9 = vpack.c.bf16 %v452_v6, %v451_v4  ;;  %v453_v10 = vld [vmem:[#allocation11 + $0x10] sm:$0xff]  ;;  %v530_v14 = vld [vmem:[%s382_s9] sm:$0xff]  ;;  %s2539_s20 = smov 104   ;;  %s2540_s15 = smov 120   ;;  %vm937_vm3 = vcmask 64512  }
  0xec   : > { %v454_v11 = vld [vmem:[#allocation11 + $0x18] sm:$0xff]  ;;  %2105 = vmatpush3.bf16.msra.mxu1 %v2104_v5  ;;  %v2107_v12 = vpack.c.bf16 %v534_v8, %v533_v7  ;;  %v611_v20 = vld [vmem:[#allocation14] sm:$0xff]  ;;  %v612_v21 = vld [vmem:[#allocation14 + $0x8] sm:$0xff]  ;;  %s2541_s16 = smov 112   ;;  %s2542_s13 = smov 8   ;;  %vm1267_vm4 = vcmask 130112  }
  0xed   : > { %2099 = vmatpush3.bf16.msra.mxu0 %v2098_v9  ;;  %2106 = vmatprep.subr.bf16.mxu1 %v2536_v0  ;;  %v2101_v13 = vpack.c.bf16 %v454_v11, %v453_v10  ;;  %v450_v15 = vld [vmem:[%s373_s21] sm:$0xff]  ;;  %v2110_v25 = vpack.c.bf16 %v612_v21, %v611_v20  ;;  %s2543_s1 = smov 16   ;;  %s2544_s25 = smov 24   ;;  %vm1437_vm5 = vcmask 195712   ;;  %vm1607_vm6 = vcmask 261312  }
  0xee   : > { %2100 = vmatprep.subr.bf16.mxu0 %v2536_v0  ;;  %v613_v36 = vld [vmem:[#allocation14 + $0x10] sm:$0xff]  ;;  %v614_v38 = vld [vmem:[#allocation14 + $0x18] sm:$0xff]  ;;  %s3184_s26 = sld [smem:[#allocation27_spill]]  ;;  %s1967_s30 = sshll.u32 %s2612_s11, 7 }
  0xef   : > { %v2113_v39 = vpack.c.bf16 %v614_v38, %v613_v36  ;;  %v610_v42 = vld [vmem:[%s391_s22] sm:$0xff]  ;;  %s449_s18 = scalar_lea.vmem [#allocation17], %s2877_s8  ;;  %s3185_s5 = sld [smem:[#allocation32_spill]] }
  0xf0   : > { %2108 = vmatpush3.bf16.msra.mxu1 %v2107_v12  ;;  %s1776_s10 = sshll.u32 %s449_s18, 4  ;;  %s1763_s21 = scalar_lea.sflag [#allocation7], %s2874_s17  ;;  %s3072_s10 = int_to_ptr.vmem [resolvable:$true] %s1776_s10 }
  0xf1   : > { %2102 = vmatpush3.bf16.msra.mxu0 %v2101_v13  ;;  %2041 = vmatprep.subr.mxu1 %v2538_v1  ;;  %s2447_s12 = scalar_lea.vmem %s3072_s10, 128  ;;  %s2545_s11 = smov [#allocation17]  }
  0xf2   : > { %2109 = vmatprep.subr.bf16.mxu0 %v2536_v0  ;;  %p2448_p9 = scmp.ne.s32.totalorder %s3072_s10, %s2447_s12  ;;  %s2451_s8 = sshll.u32 %s2545_s11, 4  ;;  %s2452_s8 = int_to_ptr.vmem [resolvable:$false] %s2451_s8 }
  0xf3   : > { %2028 = vmatmul.mubr.msk.f32.vlgmr.msra.gmra.mrb[0].mxu1 %vm455_vm1, %v530_v14  ;;  %s2453_s19 = scalar_lea.vmem %s2452_s8, 256  ;;  %p2454_p6 = scmp.lt.s32.totalorder %s3072_s10, %s2452_s8 }
  0xf4   : > { %2017 = vmatmul.mubr.msk.f32.vlgmr.msra.gmra.mrb[0].mxu0 %vm455_vm1, %v450_v15  ;;  %2043 = vmatprep.mubr.msk.f32.mxu1 %vm2537_vm0, %v2538_v1  ;;  %p3186_p13 = scmp.ne.s32.totalorder %s3184_s26, 0  ;;  %p2455_p5 = scmp.lt.s32.totalorder %s2453_s19, %s2447_s12 }
  0xf5   : > { %2038 = vmatprep.mubr.msk.f32.mxu0 %vm2537_vm0, %v2538_v1  ;;  %2111 = vmatpush3.bf16.msra.mxu0 %v2110_v25  ;;  %s3070_s27 = scalar_lea.hbm %s3185_s5, %s1967_s30 }
  0xf6   : > { %2112 = vmatprep.subr.bf16.mxu0 %v2536_v0  ;;  %p2449_p11 = pnand %p2448_p9, %p3186_p13  ;;  %p2456_p2 = por %p2455_p5, %p2454_p6 }
  0xf8   : > { %p2450_p1 = pneg %p2449_p11 }
  0xf9   : > { %2114 = vmatpush3.bf16.msra.mxu0 %v2113_v39 }
  0xfa   : > { %2051 = vmatprep.subr.mxu0 %v2538_v1  ;;  %p2457_p4 = pnand %p2456_p2, %p2450_p1 }
  0xfc   : > { %2039 = vmatmul.mubr.msk.f32.vlgmr.msra.gmra.mrb[2].mxu0 %vm455_vm1, %v610_v42 }
  0xfd   : > { %2053 = vmatprep.mubr.msk.f32.mxu0 %vm2537_vm0, %v2538_v1 }
 0x1c6   : > { %v604_v16 = vpop.f32.mrb[0].mxu1 }
 0x1c7   : > { %609 = vst.msk [vmem:[#allocation2 + $0x8] sm:$0xff] %vm455_vm1, %v604_v16  ;;  %v2029_v17 = vpop.f32.mrb[1].mxu1  ;;  %v525_v18 = vpop.f32.mrb[0].mxu0 }
 0x1c8   : > { %529 = vst.msk [vmem:[#allocation2] sm:$0xff] %vm455_vm1, %v525_v18  ;;  %v2018_v19 = vpop.f32.mrb[1].mxu0 }
 0x1ce   : > { %v771_v22 = vld [vmem:[#allocation2 + $0x8] sm:$0x3]  ;;  %v792_v23 = vld [vmem:[#allocation2 + $0xa] sm:$0x3]  ;;  %v812_v24 = vld [vmem:[#allocation2 + $0xc] sm:$0x3] }
 0x1cf   : > { %773 = vst.msk [vmem:[#allocation3 + $0x20] sm:$0x3] %vm691_vm2, %v771_v22  ;;  %793 = vst.msk [vmem:[#allocation3 + $0x28] sm:$0x3] %vm691_vm2, %v792_v23  ;;  %v832_v26 = vld [vmem:[#allocation2 + $0xe] sm:$0x3] }
 0x1d0   : > { %813 = vst.msk [vmem:[#allocation3 + $0x30] sm:$0x3] %vm691_vm2, %v812_v24  ;;  %v690_v27 = vld [vmem:[#allocation2] sm:$0x3]  ;;  %v711_v28 = vld [vmem:[#allocation2 + $0x2] sm:$0x3] }
 0x1d1   : > { %833 = vst.msk [vmem:[#allocation3 + $0x38] sm:$0x3] %vm691_vm2, %v832_v26  ;;  %692 = vst.msk [vmem:[#allocation3] sm:$0x3] %vm691_vm2, %v690_v27  ;;  %v731_v29 = vld [vmem:[#allocation2 + $0x4] sm:$0x3] }
 0x1d2   : > { %712 = vst.msk [vmem:[#allocation3 + $0x8] sm:$0x3] %vm691_vm2, %v711_v28  ;;  %v751_v30 = vld [vmem:[#allocation2 + $0x6] sm:$0x3]  ;;  %v786_v31 = vld [vmem:[#allocation2 + $0x8] sm:$0x3] }
 0x1d3   : > { %732 = vst.msk [vmem:[#allocation3 + $0x10] sm:$0x3] %vm691_vm2, %v731_v29  ;;  %752 = vst.msk [vmem:[#allocation3 + $0x18] sm:$0x3] %vm691_vm2, %v751_v30  ;;  %788 = vrot.lane.b32.xlu1 %v786_v31, %s2539_s20  ;;  %v774_v32 = vld [vmem:[#allocation2 + $0x8] sm:$0x3] }
 0x1d4   : > { %776 = vrot.lane.b32.xlu0 %v774_v32, %s2540_s15  ;;  %v693_v33 = vld [vmem:[#allocation2] sm:$0x3]  ;;  %v780_v34 = vld [vmem:[#allocation2 + $0x8] sm:$0x3]  ;;  %v800_v40 = vld [vmem:[#allocation2 + $0xa] sm:$0x3] }
 0x1d5   : > { %v705_v35 = vld [vmem:[#allocation2] sm:$0x3]  ;;  %v794_v41 = vld [vmem:[#allocation2 + $0xa] sm:$0x3]  ;;  %v713_v43 = vld [vmem:[#allocation2 + $0x2] sm:$0x3] }
 0x1d6   : > { %v699_v37 = vld [vmem:[#allocation2] sm:$0x3]  ;;  %v806_v44 = vld [vmem:[#allocation2 + $0xa] sm:$0x3]  ;;  %v725_v45 = vld [vmem:[#allocation2 + $0x2] sm:$0x3] }
 0x1d7   : > { %695 = vrot.lane.b32.xlu1 %v693_v33, %s2540_s15  ;;  %v719_v46 = vld [vmem:[#allocation2 + $0x2] sm:$0x3]  ;;  %v820_v47 = vld [vmem:[#allocation2 + $0xc] sm:$0x3]  ;;  %v733_v49 = vld [vmem:[#allocation2 + $0x4] sm:$0x3] }
 0x1d8   : > { %782 = vrot.lane.b32.xlu0 %v780_v34, %s2541_s16  ;;  %v814_v48 = vld [vmem:[#allocation2 + $0xc] sm:$0x3]  ;;  %v745_v51 = vld [vmem:[#allocation2 + $0x4] sm:$0x3]  ;;  %v840_v53 = vld [vmem:[#allocation2 + $0xe] sm:$0x3] }
 0x1d9   : > { %v826_v50 = vld [vmem:[#allocation2 + $0xc] sm:$0x3]  ;;  %v739_v52 = vld [vmem:[#allocation2 + $0x4] sm:$0x3]  ;;  %v834_v54 = vld [vmem:[#allocation2 + $0xe] sm:$0x3] }
 0x1da   : > { %v753_v55 = vld [vmem:[#allocation2 + $0x6] sm:$0x3]  ;;  %v846_v56 = vld [vmem:[#allocation2 + $0xe] sm:$0x3]  ;;  %v684_v33 = vpop.f32.mrb[2].mxu0 }
 0x1db   : > { %707 = vrot.lane.b32.xlu1 %v705_v35, %s2539_s20  ;;  %v765_v57 = vld [vmem:[#allocation2 + $0x6] sm:$0x3]  ;;  %689 = vst.msk [vmem:[#allocation2 + $0x10] sm:$0xff] %vm455_vm1, %v684_v33  ;;  %v2040_v34 = vpop.f32.mrb[3].mxu0 }
 0x1dc   : > { %701 = vrot.lane.b32.xlu0 %v699_v37, %s2541_s16  ;;  %v759_v58 = vld [vmem:[#allocation2 + $0x6] sm:$0x3] }
 0x1df   : > { %802 = vrot.lane.b32.xlu1 %v800_v40, %s2541_s16 }
 0x1e0   : > { %796 = vrot.lane.b32.xlu0 %v794_v41, %s2540_s15 }
 0x1e2   : > { %v852_v35 = vld [vmem:[#allocation2 + $0x10] sm:$0x3]  ;;  %v873_v36 = vld [vmem:[#allocation2 + $0x12] sm:$0x3]  ;;  %v893_v37 = vld [vmem:[#allocation2 + $0x14] sm:$0x3] }
 0x1e3   : > { %715 = vrot.lane.b32.xlu1 %v713_v43, %s2540_s15  ;;  %v913_v38 = vld [vmem:[#allocation2 + $0x16] sm:$0x3]  ;;  %854 = vst.msk [vmem:[#allocation3 + $0x40] sm:$0x3] %vm691_vm2, %v852_v35  ;;  %874 = vst.msk [vmem:[#allocation3 + $0x48] sm:$0x3] %vm691_vm2, %v873_v36 }
 0x1e4   : > { %808 = vrot.lane.b32.xlu0 %v806_v44, %s2539_s20  ;;  %894 = vst.msk [vmem:[#allocation3 + $0x50] sm:$0x3] %vm691_vm2, %v893_v37  ;;  %914 = vst.msk [vmem:[#allocation3 + $0x58] sm:$0x3] %vm691_vm2, %v913_v38 }
 0x1e7   : > { %727 = vrot.lane.b32.xlu1 %v725_v45, %s2539_s20 }
 0x1e8   : > { %721 = vrot.lane.b32.xlu0 %v719_v46, %s2541_s16 }
 0x1eb   : > { %822 = vrot.lane.b32.xlu1 %v820_v47, %s2541_s16 }
 0x1ec   : > { %816 = vrot.lane.b32.xlu0 %v814_v48, %s2540_s15  ;;  %v855_v48 = vld [vmem:[#allocation2 + $0x10] sm:$0x3] }
 0x1ef   : > { %735 = vrot.lane.b32.xlu1 %v733_v49, %s2540_s15  ;;  %v867_v49 = vld [vmem:[#allocation2 + $0x10] sm:$0x3] }
 0x1f0   : > { %828 = vrot.lane.b32.xlu0 %v826_v50, %s2539_s20 }
 0x1f3   : > { %747 = vrot.lane.b32.xlu1 %v745_v51, %s2539_s20 }
 0x1f4   : > { %741 = vrot.lane.b32.xlu0 %v739_v52, %s2541_s16 }
 0x1f7   : > { %842 = vrot.lane.b32.xlu1 %v840_v53, %s2541_s16  ;;  %v875_v53 = vld [vmem:[#allocation2 + $0x12] sm:$0x3] }
 0x1f8   : > { %836 = vrot.lane.b32.xlu0 %v834_v54, %s2540_s15  ;;  %v887_v54 = vld [vmem:[#allocation2 + $0x12] sm:$0x3] }
 0x1fb   : > { %755 = vrot.lane.b32.xlu1 %v753_v55, %s2540_s15  ;;  %v901_v55 = vld [vmem:[#allocation2 + $0x14] sm:$0x3] }
 0x1fc   : > { %848 = vrot.lane.b32.xlu0 %v846_v56, %s2539_s20  ;;  %v915_v56 = vld [vmem:[#allocation2 + $0x16] sm:$0x3] }
 0x1ff   : > { %767 = vrot.lane.b32.xlu1 %v765_v57, %s2539_s20  ;;  %v861_v57 = vld [vmem:[#allocation2 + $0x10] sm:$0x3] }
 0x200   : > { %761 = vrot.lane.b32.xlu0 %v759_v58, %s2541_s16  ;;  %v881_v58 = vld [vmem:[#allocation2 + $0x12] sm:$0x3] }
 0x245   : > { %v789_v59 = vpop.permute.xlu1 %788 }
 0x246   : > { %791 = vst.msk [vmem:[#allocation3 + $0x26] sm:$0x3] %vm691_vm2, %v789_v59  ;;  %v777_v60 = vpop.permute.xlu0 %776  ;;  %v895_v59 = vld [vmem:[#allocation2 + $0x14] sm:$0x3] }
 0x247   : > { %779 = vst.msk [vmem:[#allocation3 + $0x22] sm:$0x3] %vm691_vm2, %v777_v60  ;;  %v907_v60 = vld [vmem:[#allocation2 + $0x14] sm:$0x3] }
 0x249   : > { %v696_v61 = vpop.permute.xlu1 %695 }
 0x24a   : > { %v783_v62 = vpop.permute.xlu0 %782  ;;  %698 = vst.msk [vmem:[#allocation3 + $0x2] sm:$0x3] %vm691_vm2, %v696_v61 }
 0x24b   : > { %785 = vst.msk [vmem:[#allocation3 + $0x24] sm:$0x3] %vm691_vm2, %v783_v62 }
 0x24d   : > { %v708_v63 = vpop.permute.xlu1 %707 }
 0x24e   : > { %v702_v2 = vpop.permute.xlu0 %701  ;;  %710 = vst.msk [vmem:[#allocation3 + $0x6] sm:$0x3] %vm691_vm2, %v708_v63 }
 0x24f   : > { %704 = vst.msk [vmem:[#allocation3 + $0x4] sm:$0x3] %vm691_vm2, %v702_v2 }
 0x251   : > { %v803_v3 = vpop.permute.xlu1 %802 }
 0x252   : > { %v797_v4 = vpop.permute.xlu0 %796  ;;  %805 = vst.msk [vmem:[#allocation3 + $0x2c] sm:$0x3] %vm691_vm2, %v803_v3  ;;  %v935_v5 = vld [vmem:[#allocation3 + $0x20] sm:$0xff] }
 0x253   : > { %799 = vst.msk [vmem:[#allocation3 + $0x2a] sm:$0x3] %vm691_vm2, %v797_v4  ;;  %2042 = vmatpush3.xpose.msk.msra.mxu1 %vm937_vm3, %v935_v5 }
 0x254   : > { %2046 = vmatprep.subr.mxu1 %v2538_v1 }
 0x255   : > { %v716_v6 = vpop.permute.xlu1 %715 }
 0x256   : > { %v809_v7 = vpop.permute.xlu0 %808  ;;  %718 = vst.msk [vmem:[#allocation3 + $0xa] sm:$0x3] %vm691_vm2, %v716_v6  ;;  %v933_v8 = vld [vmem:[#allocation3] sm:$0xff] }
 0x257   : > { %811 = vst.msk [vmem:[#allocation3 + $0x2e] sm:$0x3] %vm691_vm2, %v809_v7  ;;  %v934_v9 = vmul.f32 0.35355338, %v933_v8 }
 0x259   : > { %2044 = vmatmul.mubr.msk.f32.vlgmr.msra.gmra.mrb[2].mxu1 %vm937_vm3, %v934_v9  ;;  %v728_v10 = vpop.permute.xlu1 %727 }
 0x25a   : > { %v722_v11 = vpop.permute.xlu0 %721  ;;  %730 = vst.msk [vmem:[#allocation3 + $0xe] sm:$0x3] %vm691_vm2, %v728_v10  ;;  %2048 = vmatprep.mubr.msk.f32.mxu1 %vm2537_vm0, %v2538_v1 }
 0x25b   : > { %724 = vst.msk [vmem:[#allocation3 + $0xc] sm:$0x3] %vm691_vm2, %v722_v11 }
 0x25d   : > { %v823_v12 = vpop.permute.xlu1 %822 }
 0x25e   : > { %v817_v13 = vpop.permute.xlu0 %816  ;;  %825 = vst.msk [vmem:[#allocation3 + $0x34] sm:$0x3] %vm691_vm2, %v823_v12  ;;  %v1101_v14 = vld [vmem:[#allocation3 + $0x28] sm:$0xff] }
 0x25f   : > { %819 = vst.msk [vmem:[#allocation3 + $0x32] sm:$0x3] %vm691_vm2, %v817_v13  ;;  %2052 = vmatpush3.xpose.msk.msra.mxu0 %vm937_vm3, %v1101_v14 }
 0x260   : > { %2061 = vmatprep.subr.mxu0 %v2538_v1 }
 0x261   : > { %v736_v15 = vpop.permute.xlu1 %735 }
 0x262   : > { %v829_v16 = vpop.permute.xlu0 %828  ;;  %738 = vst.msk [vmem:[#allocation3 + $0x12] sm:$0x3] %vm691_vm2, %v736_v15  ;;  %v1099_v17 = vld [vmem:[#allocation3 + $0x8] sm:$0xff] }
 0x263   : > { %831 = vst.msk [vmem:[#allocation3 + $0x36] sm:$0x3] %vm691_vm2, %v829_v16  ;;  %v1100_v18 = vmul.f32 0.35355338, %v1099_v17 }
 0x265   : > { %2054 = vmatmul.mubr.msk.f32.vlgmr.msra.gmra.mrb[4].mxu0 %vm937_vm3, %v1100_v18  ;;  %v748_v19 = vpop.permute.xlu1 %747 }
 0x266   : > { %v742_v20 = vpop.permute.xlu0 %741  ;;  %750 = vst.msk [vmem:[#allocation3 + $0x16] sm:$0x3] %vm691_vm2, %v748_v19  ;;  %2063 = vmatprep.mubr.msk.f32.mxu0 %vm2537_vm0, %v2538_v1 }
 0x267   : > { %744 = vst.msk [vmem:[#allocation3 + $0x14] sm:$0x3] %vm691_vm2, %v742_v20 }
 0x269   : > { %v843_v21 = vpop.permute.xlu1 %842 }
 0x26a   : > { %v837_v22 = vpop.permute.xlu0 %836  ;;  %845 = vst.msk [vmem:[#allocation3 + $0x3c] sm:$0x3] %vm691_vm2, %v843_v21  ;;  %v1271_v23 = vld [vmem:[#allocation3 + $0x30] sm:$0xff] }
 0x26b   : > { %839 = vst.msk [vmem:[#allocation3 + $0x3a] sm:$0x3] %vm691_vm2, %v837_v22  ;;  %2062 = vmatpush3.xpose.msk.msra.mxu0 %vm937_vm3, %v1271_v23 }
 0x26c   : > { %2071 = vmatprep.subr.mxu0 %v2538_v1 }
 0x26d   : > { %v756_v24 = vpop.permute.xlu1 %755 }
 0x26e   : > { %v849_v25 = vpop.permute.xlu0 %848  ;;  %758 = vst.msk [vmem:[#allocation3 + $0x1a] sm:$0x3] %vm691_vm2, %v756_v24  ;;  %v1269_v26 = vld [vmem:[#allocation3 + $0x10] sm:$0xff] }
 0x26f   : > { %851 = vst.msk [vmem:[#allocation3 + $0x3e] sm:$0x3] %vm691_vm2, %v849_v25  ;;  %v1270_v27 = vmul.f32 0.35355338, %v1269_v26 }
 0x271   : > { %2064 = vmatmul.mubr.msk.f32.vlgmr.msra.gmra.mrb[6].mxu0 %vm937_vm3, %v1270_v27  ;;  %v768_v28 = vpop.permute.xlu1 %767 }
 0x272   : > { %v762_v29 = vpop.permute.xlu0 %761  ;;  %770 = vst.msk [vmem:[#allocation3 + $0x1e] sm:$0x3] %vm691_vm2, %v768_v28  ;;  %2073 = vmatprep.mubr.msk.f32.mxu0 %vm2537_vm0, %v2538_v1 }
 0x273   : > { %764 = vst.msk [vmem:[#allocation3 + $0x1c] sm:$0x3] %vm691_vm2, %v762_v29 }
 0x276   : > { %v1441_v30 = vld [vmem:[#allocation3 + $0x38] sm:$0xff] }
 0x277   : > { %2072 = vmatpush3.xpose.msk.msra.mxu0 %vm937_vm3, %v1441_v30  ;;  %v927_v30 = vld [vmem:[#allocation2 + $0x16] sm:$0x3] }
 0x278   : > { %2081 = vmatprep.subr.mxu0 %v2538_v1 }
 0x27a   : > { %v1439_v31 = vld [vmem:[#allocation3 + $0x18] sm:$0xff] }
 0x27b   : > { %v1440_v32 = vmul.f32 0.35355338, %v1439_v31  ;;  %v921_v31 = vld [vmem:[#allocation2 + $0x16] sm:$0x3] }
 0x27d   : > { %2074 = vmatmul.mubr.msk.f32.vlgmr.msra.gmra.mrb[8].mxu0 %vm937_vm3, %v1440_v32 }
 0x27e   : > { %2083 = vmatprep.mubr.msk.f32.mxu0 %vm2537_vm0, %v2538_v1 }
 0x32c   : > { %v1010_v39 = vpop.f32.mrb[2].mxu1 }
 0x32d   : > { %v2045_v40 = vpop.f32.mrb[3].mxu1  ;;  %v1014_v41 = vsel %vm937_vm3, %v1010_v39, -inf }
 0x32e   : > { %1015 = vmax.xlane.f32.xlu0 %v1014_v41 }
 0x338   : > { %v1175_v42 = vpop.f32.mrb[4].mxu0 }
 0x339   : > { %v2055_v43 = vpop.f32.mrb[5].mxu0  ;;  %v1179_v44 = vsel %vm937_vm3, %v1175_v42, -inf }
 0x33a   : > { %1180 = vmax.xlane.f32.xlu1 %v1179_v44 }
 0x344   : > { %v1345_v45 = vpop.f32.mrb[6].mxu0 }
 0x345   : > { %v2065_v46 = vpop.f32.mrb[7].mxu0  ;;  %v1349_v47 = vsel %vm937_vm3, %v1345_v45, -inf }
 0x346   : > { %1350 = vmax.xlane.f32.xlu0 %v1349_v47 }
 0x34b   : > { %857 = vrot.lane.b32.xlu1 %v855_v48, %s2540_s15 }
 0x34f   : > { %869 = vrot.lane.b32.xlu1 %v867_v49, %s2539_s20 }
 0x350   : > { %v1515_v50 = vpop.f32.mrb[8].mxu0 }
 0x351   : > { %v2075_v51 = vpop.f32.mrb[9].mxu0  ;;  %v1519_v52 = vsel %vm937_vm3, %v1515_v50, -inf }
 0x352   : > { %1520 = vmax.xlane.f32.xlu0 %v1519_v52 }
 0x353   : > { %877 = vrot.lane.b32.xlu1 %v875_v53, %s2540_s15 }
 0x357   : > { %889 = vrot.lane.b32.xlu1 %v887_v54, %s2539_s20 }
 0x35b   : > { %903 = vrot.lane.b32.xlu1 %v901_v55, %s2541_s16  ;;  %v1684_v55 = vld [vmem:[#allocation16] sm:$0xff] }
 0x35f   : > { %917 = vrot.lane.b32.xlu1 %v915_v56, %s2540_s15  ;;  %v1685_v56 = vld [vmem:[#allocation16 + $0x8] sm:$0xff] }
 0x368   : > { %863 = vrot.lane.b32.xlu0 %v861_v57, %s2541_s16  ;;  %v1686_v57 = vld [vmem:[#allocation16 + $0x10] sm:$0xff] }
 0x36c   : > { %883 = vrot.lane.b32.xlu0 %v881_v58, %s2541_s16  ;;  %v2116_v58 = vpack.c.bf16 %v1685_v56, %v1684_v55 }
 0x370   : > { %897 = vrot.lane.b32.xlu0 %v895_v59, %s2540_s15  ;;  %v1687_v59 = vld [vmem:[#allocation16 + $0x18] sm:$0xff] }
 0x374   : > { %909 = vrot.lane.b32.xlu0 %v907_v60, %s2539_s20 }
 0x3bb   : > { %v1016_v61 = vpop.xlane.xlu0 %1015 }
 0x3bc   : > { %v1017_v62 = vsub.f32 %v1010_v39, %v1016_v61 }
 0x3be   : > { %v1018_v63 = vmul.f32 1.442695, %v1017_v62 }
 0x3c0   : > { %2229 = vpow2.f32 %v1018_v63 }
 0x3c7   : > { %v1181_v2 = vpop.xlane.xlu1 %1180 }
 0x3c8   : > { %v1182_v3 = vsub.f32 %v1175_v42, %v1181_v2 }
 0x3ca   : > { %v2230_v4 = vpop.eup %2229  ;;  %v1183_v5 = vmul.f32 1.442695, %v1182_v3  ;;  %v1609_v3 = vld [vmem:[%s3122_s7] sm:$0xff] }
 0x3cb   : > { %v858_v6 = vpop.permute.xlu1 %857  ;;  %v1020_v7 = vsel %vm937_vm3, %v2230_v4, 0.0 }
 0x3cc   : > { %2231 = vpow2.f32 %v1183_v5  ;;  %860 = vst.msk [vmem:[#allocation3 + $0x42] sm:$0x3] %vm691_vm2, %v858_v6  ;;  %1021 = vadd.xlane.f32.xlu1 %v1020_v7 }
 0x3cf   : > { %v870_v8 = vpop.permute.xlu1 %869 }
 0x3d0   : > { %872 = vst.msk [vmem:[#allocation3 + $0x46] sm:$0x3] %vm691_vm2, %v870_v8 }
 0x3d3   : > { %v878_v9 = vpop.permute.xlu1 %877  ;;  %v1351_v10 = vpop.xlane.xlu0 %1350 }
 0x3d4   : > { %880 = vst.msk [vmem:[#allocation3 + $0x4a] sm:$0x3] %vm691_vm2, %v878_v9  ;;  %v1352_v11 = vsub.f32 %v1345_v45, %v1351_v10 }
 0x3d6   : > { %v2232_v12 = vpop.eup %2231  ;;  %v1353_v13 = vmul.f32 1.442695, %v1352_v11 }
 0x3d7   : > { %v890_v14 = vpop.permute.xlu1 %889  ;;  %v1185_v15 = vsel %vm937_vm3, %v2232_v12, 0.0 }
 0x3d8   : > { %2233 = vpow2.f32 %v1353_v13  ;;  %892 = vst.msk [vmem:[#allocation3 + $0x4e] sm:$0x3] %vm691_vm2, %v890_v14  ;;  %1186 = vadd.xlane.f32.xlu0 %v1185_v15 }
 0x3db   : > { %v904_v16 = vpop.permute.xlu1 %903 }
 0x3dc   : > { %906 = vst.msk [vmem:[#allocation3 + $0x54] sm:$0x3] %vm691_vm2, %v904_v16 }
 0x3df   : > { %v918_v17 = vpop.permute.xlu1 %917  ;;  %v1521_v18 = vpop.xlane.xlu0 %1520 }
 0x3e0   : > { %920 = vst.msk [vmem:[#allocation3 + $0x5a] sm:$0x3] %vm691_vm2, %v918_v17  ;;  %v1522_v19 = vsub.f32 %v1515_v50, %v1521_v18 }
 0x3e2   : > { %v2234_v20 = vpop.eup %2233  ;;  %v1523_v21 = vmul.f32 1.442695, %v1522_v19 }
 0x3e3   : > { %v864_v22 = vpop.permute.xlu0 %863  ;;  %v1355_v23 = vsel %vm937_vm3, %v2234_v20, 0.0 }
 0x3e4   : > { %2235 = vpow2.f32 %v1523_v21  ;;  %866 = vst.msk [vmem:[#allocation3 + $0x44] sm:$0x3] %vm691_vm2, %v864_v22  ;;  %1356 = vadd.xlane.f32.xlu1 %v1355_v23 }
 0x3e7   : > { %v884_v24 = vpop.permute.xlu0 %883 }
 0x3e8   : > { %886 = vst.msk [vmem:[#allocation3 + $0x4c] sm:$0x3] %vm691_vm2, %v884_v24 }
 0x3eb   : > { %v898_v25 = vpop.permute.xlu0 %897  ;;  %v936_v26 = vld [vmem:[#allocation3 + $0x40] sm:$0xff] }
 0x3ec   : > { %900 = vst.msk [vmem:[#allocation3 + $0x52] sm:$0x3] %vm691_vm2, %v898_v25  ;;  %2047 = vmatpush3.msra.mxu1 %v936_v26 }
 0x3ed   : > { %2056 = vmatprep.subr.mxu1 %v2538_v1 }
 0x3ee   : > { %v2236_v27 = vpop.eup %2235 }
 0x3ef   : > { %v910_v28 = vpop.permute.xlu0 %909  ;;  %v1525_v29 = vsel %vm937_vm3, %v2236_v27, 0.0  ;;  %v1102_v36 = vld [vmem:[#allocation3 + $0x48] sm:$0xff] }
 0x3f0   : > { %912 = vst.msk [vmem:[#allocation3 + $0x56] sm:$0x3] %vm691_vm2, %v910_v28  ;;  %1526 = vadd.xlane.f32.xlu0 %v1525_v29 }
 0x3f5   : > { %929 = vrot.lane.b32.xlu1 %v927_v30, %s2539_s20 }
 0x3f7   : > { %v1272_v40 = vld [vmem:[#allocation3 + $0x50] sm:$0xff] }
 0x406   : > { %923 = vrot.lane.b32.xlu0 %v921_v31, %s2541_s16 }
 0x459   : > { %v1022_v32 = vpop.xlane.xlu1 %1021 }
 0x45a   : > { %2237 = vrcp.f32 %v1022_v32 }
 0x464   : > { %v2238_v33 = vpop.eup %2237 }
 0x465   : > { %v1024_v34 = vmul.f32 %v2238_v33, %v2230_v4  ;;  %v1187_v35 = vpop.xlane.xlu0 %1186 }
 0x466   : > { %2239 = vrcp.f32 %v1187_v35 }
 0x467   : > { %2049 = vmatmul.mubr.msk.f32.vlgmr.msra.gmra.mrb[4].mxu1 %vm937_vm3, %v1024_v34 }
 0x468   : > { %2057 = vmatpush3.msra.mxu1 %v1102_v36  ;;  %2058 = vmatprep.mubr.msk.f32.mxu1 %vm2537_vm0, %v2538_v1 }
 0x469   : > { %2066 = vmatprep.subr.mxu1 %v2538_v1 }
 0x470   : > { %v2240_v37 = vpop.eup %2239 }
 0x471   : > { %v1189_v38 = vmul.f32 %v2240_v37, %v2232_v12  ;;  %v1357_v39 = vpop.xlane.xlu1 %1356 }
 0x472   : > { %2241 = vrcp.f32 %v1357_v39 }
 0x473   : > { %2059 = vmatmul.mubr.msk.f32.vlgmr.msra.gmra.mrb[6].mxu1 %vm937_vm3, %v1189_v38 }
 0x474   : > { %2067 = vmatpush3.msra.mxu1 %v1272_v40  ;;  %2068 = vmatprep.mubr.msk.f32.mxu1 %vm2537_vm0, %v2538_v1 }
 0x475   : > { %v930_v41 = vpop.permute.xlu1 %929  ;;  %2076 = vmatprep.subr.mxu1 %v2538_v1 }
 0x476   : > { %932 = vst.msk [vmem:[#allocation3 + $0x5e] sm:$0x3] %vm691_vm2, %v930_v41 }
 0x47c   : > { %v2242_v42 = vpop.eup %2241 }
 0x47d   : > { %v1359_v43 = vmul.f32 %v2242_v42, %v2234_v20  ;;  %v1527_v44 = vpop.xlane.xlu0 %1526 }
 0x47e   : > { %2243 = vrcp.f32 %v1527_v44 }
 0x47f   : > { %2069 = vmatmul.mubr.msk.f32.vlgmr.msra.gmra.mrb[8].mxu1 %vm937_vm3, %v1359_v43 }
 0x480   : > { %2078 = vmatprep.mubr.msk.f32.mxu1 %vm2537_vm0, %v2538_v1 }
 0x481   : > { %v924_v45 = vpop.permute.xlu0 %923 }
 0x482   : > { %926 = vst.msk [vmem:[#allocation3 + $0x5c] sm:$0x3] %vm691_vm2, %v924_v45 }
 0x488   : > { %v2244_v46 = vpop.eup %2243 }
 0x489   : > { %v1529_v47 = vmul.f32 %v2244_v46, %v2236_v27  ;;  %v1442_v48 = vld [vmem:[#allocation3 + $0x58] sm:$0xff] }
 0x48a   : > { %2077 = vmatpush3.msra.mxu1 %v1442_v48 }
 0x48b   : > { %2079 = vmatmul.mubr.msk.f32.vlgmr.msra.gmra.mrb[10].mxu1 %vm937_vm3, %v1529_v47  ;;  %2115 = vmatprep.subr.bf16.mxu1 %v2536_v0 }
 0x48c   : > { %2094 = vmatprep.mubr.msk.f32.mxu1 %vm2537_vm0, %v2538_v1  ;;  %2117 = vmatpush3.bf16.msra.mxu1 %v2116_v58  ;;  %v2119_v1 = vpack.c.bf16 %v1687_v59, %v1686_v57 }
 0x48d   : > { %2118 = vmatprep.subr.bf16.mxu1 %v2536_v0 }
 0x490   : > { %2120 = vmatpush3.bf16.msra.mxu1 %v2119_v1 }
 0x53a   : > { %v1094_v49 = vpop.f32.mrb[4].mxu1 }
 0x53b   : > { %1098 = vst.msk [vmem:[#allocation4] sm:$0xff] %vm937_vm3, %v1094_v49  ;;  %v2050_v50 = vpop.f32.mrb[5].mxu1 }
 0x546   : > { %v1259_v51 = vpop.f32.mrb[6].mxu1 }
 0x547   : > { %1264 = vrot.lane.b32.xlu0 %v1259_v51, %s2542_s13  ;;  %v2060_v52 = vpop.f32.mrb[7].mxu1 }
 0x552   : > { %v1429_v53 = vpop.f32.mrb[8].mxu1 }
 0x553   : > { %1434 = vrot.lane.b32.xlu1 %v1429_v53, %s2543_s1  ;;  %v2070_v54 = vpop.f32.mrb[9].mxu1 }
 0x55e   : > { %v1599_v60 = vpop.f32.mrb[10].mxu1 }
 0x55f   : > { %1604 = vrot.lane.b32.xlu0 %v1599_v60, %s2544_s25  ;;  %v2080_v61 = vpop.f32.mrb[11].mxu1 }
 0x5b9   : > { %v1265_v62 = vpop.permute.xlu0 %1264 }
 0x5ba   : > { %1268 = vst.msk [vmem:[#allocation4] sm:$0xff] %vm1267_vm4, %v1265_v62 }
 0x5c5   : > { %v1435_v63 = vpop.permute.xlu1 %1434 }
 0x5c6   : > { %1438 = vst.msk [vmem:[#allocation4] sm:$0xff] %vm1437_vm5, %v1435_v63 }
 0x5d1   : > { %v1605_v2 = vpop.permute.xlu0 %1604 }
 0x5d2   : > { %1608 = vst.msk [vmem:[#allocation4] sm:$0xff] %vm1607_vm6, %v1605_v2 }
 0x5d9   : > { %v1610_v4 = vld [vmem:[#allocation4] sm:$0xff] }
 0x5da   : > { %2082 = vmatpush3.msra.mxu0 %v1610_v4 }
 0x5db   : > { %2084 = vmatmul.mubr.msk.f32.vlgmr.msra.gmra.mrb[10].mxu0 %vm937_vm3, %v1609_v3 }
 0x6ae   : > { %v1680_v0 = vpop.f32.mrb[10].mxu0 }
 0x6af   : > { %v2085_v5 = vpop.f32.mrb[11].mxu0  ;;  %2095 = vmatmul.mubr.msk.f32.vlgmr.msra.gmra.mrb[12].mxu1 %vm455_vm1, %v1680_v0 }
 0x782   : > { %v1757_v6 = vpop.f32.mrb[12].mxu1 }
 0x783   : > { %1761 = vst.msk [vmem:[%s449_s18] sm:$0xff] %vm455_vm1, %v1757_v6  ;;  %v2096_v7 = vpop.f32.mrb[13].mxu1 }
 0x784   : > { %2460 = shalt.err (!%p2457_p4)
}
 0x785   : > { %s2461_s17 = scalar_lea.hbm %s3070_s27, 128  ;;  %s2465_s20 = scalar_lea.hbm %s3185_s5, 256 }
 0x786   : > { %p2462_p10 = scmp.ne.s32.totalorder %s3070_s27, %s2461_s17  ;;  %p2466_p12 = scmp.lt.u32.totalorder %s3070_s27, %s3185_s5 }
 0x787   : > { %p2467_p0 = scmp.lt.u32.totalorder %s2465_s20, %s2461_s17  ;;  %p2469_p9 = scmp.lt.u32.totalorder %s2461_s17, %s3070_s27 }
 0x788   : > { %p2463_p3 = pnand %p2462_p10, %p3186_p13 }
 0x789   : > { %p2468_p7 = por %p2467_p0, %p2466_p12 }
 0x78a   : > { %p2464_p8 = pneg %p2463_p3 }
 0x78b   : > { %p2470_p11 = por %p2469_p9, %p2468_p7 }
 0x78d   : > { %p2471_p1 = pnand %p2470_p11, %p2464_p8 }
 0x78f   : > { %2474 = shalt.err (!%p2471_p1)
}
 0x790   : > { %2143 = dma.vmem_to_hbm [thread:$0]  (%p3186_p13), %s3072_s10, 128, %s3070_s27, %s1763_s21  }
 0x791 PF: > { %s3187_s13 = sld [smem:[#allocation23_spill]]  ;;  %s3188_s1 = sld [smem:[#allocation28_spill]] }
 0x792   : > { %s3189_s25 = sld [smem:[#allocation24_spill]] }
 0x797   : > { %s1788_s3 = sand.u32 1, %s3187_s13   ;;  %p3190_p6 = scmp.ne.s32.totalorder %s3188_s1, 0 }
 0x798   : > { %p3191_p5 = scmp.ge.s32.totalorder %s3189_s25, 2  ;;  %s1789_s14 = scalar_lea.sflag [#allocation7], %s1788_s3 }
 0x79a   : > { %p2169_p2 = pnand %p3191_p5, %p3190_p6 }
 0x79c   : > { %2508 = dma.done.wait (!%p2169_p2), %s1789_s14, 128  }
 0x79d   : > { %2510 = vsyncadd (!%p2169_p2), %s1789_s14, 4294967168  ;;  %s3192_s30 = sld [smem:[#allocation25_spill]]  ;;  %s3193_s18 = sld [smem:[#allocation26_spill]] }
 0x79e   : > { %s3194_s27 = smov %s2517_s28  ;;  %s3195_s28 = smov %s2521_s29 }
 0x7a3   : > { %p26_p4 = scmp.ge.s32.totalorder %s3192_s30, 4   ;;  %s3196_s29 = smov %s3193_s18 }
 0x7a5   :  { %28 = sbr.rel (!%p26_p4) target bundleno = 14 (0xe), region = 141 }
 0x7ac   :  { %1794 = vsyncpa [#allocation6], 1 }
 0x7ad   :  { %1796 = vsyncpa [#allocation6 + $0x1], 1 }
 0x7ae   :  { %1797 = vsyncpa [#allocation9], 1 }
 0x7af   :  { %1799 = vsyncpa [#allocation9 + $0x1], 1 }
 0x7b0   :  { %1800 = vsyncpa [#allocation12], 1 }
 0x7b1   :  { %1801 = vsyncpa [#allocation15], 1 }
 0x7b2   :  { %1802 = vsyncpa [#allocation7], 1 }
 0x7b3   :  { %1804 = vsyncpa [#allocation7 + $0x1], 1 }

</bundles_post_ra>
